<compile_context>
chip_gen: v6e
topology: v6e:2x2x1
jax: 0.10.0
libtpu: 0.0.40
codegen_flags: <defaults>
</compile_context>

<pallas_src>
import functools
from math import comb

import jax
import jax.numpy as jnp
from jax.experimental import pallas as pl
from jax.experimental.pallas import tpu as pltpu

EPS = 1e-16


def mfa_kernel(params_ref, x_ref, xt_ref, d_ref, c_ref, s_ref, mask_ref,
               oh_ref, elb_rows_ref, gamma_ref, *, M, Mc, P, Q):
    b0 = params_ref[0, 0]
    b1 = params_ref[0, 1]
    b2 = params_ref[0, 2]
    lam = params_ref[0, 3]
    eta = params_ref[0, 4]
    nu = params_ref[0, 5]
    mu = params_ref[0, 6]
    T = params_ref[0, 7]

    X = x_ref[...]            # (tI, N)  rows of X for this row tile
    XT = xt_ref[...]          # (tI, N)  rows of X^T for this tile (= cols of X)
    Db = d_ref[...]
    Cb = c_ref[...]
    Sb = s_ref[...]
    Mb = mask_ref[...]

    NJ = oh_ref.shape[2]      # full N (gathered axis == column count)

    X_ = 1.0 - X + EPS
    lX_ = jnp.log(X_)
    row_lsum = jnp.sum(lX_, axis=1, keepdims=True)     # (tI, 1)
    tmp0 = jnp.exp(row_lsum - lX_)                     # prod_{k != j} (1 - X[i,k])
    XX_ = X / X_

    # ---- all gathers as ONE batched MXU contraction (bf16 in, f32 acc) ----
    xxb = XX_.astype(oh_ref.dtype)[:, None, :]         # (tI, 1, N)
    oh = oh_ref[...]                                   # (tI, J, N) bf16
    # res[i, 0, j] = sum_k XX_[i, k] * OH[i, j, k]
    res = jnp.einsum('bqd,bkd->bqk', xxb, oh,
                     preferred_element_type=jnp.float32)   # (tI, 1, J)
    resXX = res[:, 0, :]                               # (tI, J) gathered XX_ values

    off_f = M * NJ
    off_t = off_f + Mc * NJ
    off_it = off_t + Mc * NJ

    # ---- idx_ij block: locUp0 and kap-weighted gathered-X sum ----
    k_sum = 0.0
    locUp0 = jnp.zeros_like(X)
    w_kap = jnp.zeros_like(X)        # sum_m kap_m * X[i, idx_ij[i,j,m]]
    for m in range(M):
        kap_m = params_ref[0, 8 + m]
        k_sum = k_sum + kap_m
        g = resXX[:, m * NJ:(m + 1) * NJ]              # gathered XX_ values
        locUp0 = locUp0 + g
        # gathered X recovered exactly: X* / (1 - X*) -> X* = g / (1 + g)
        w_kap = w_kap + kap_m * (g / (1.0 + g))

    # ---- idx_ijF / idx_ijT block: locUp1 ----
    locUp1 = jnp.zeros_like(X)
    for m in range(Mc):
        gF = resXX[:, off_f + m * NJ: off_f + (m + 1) * NJ]
        gTsum = resXX[:, off_t + m * NJ: off_t + (m + 1) * NJ]
        locUp1 = locUp1 + gF * gTsum

    coef = lam + eta * Db + nu * Cb + mu * Sb

    gamma = (b1 - b0 + (b2 - b1) * locUp0 - b2 * locUp1) * tmp0
    gamma = gamma + (4.0 * XT - 2.0) * coef + 100.0 * (Mb - 1.0)
    gamma = gamma + (4.0 * w_kap - 2.0 * k_sum)

    # sigmoid(gamma / T) with the reciprocal on the EUP slot
    gamma_ref[...] = pl.reciprocal(1.0 + jnp.exp(-(gamma / T)), approx=True)

    # ---- per-row elb partials ----
    it_sum = jnp.zeros((X.shape[0], 1), dtype=jnp.float32)
    for p in range(P):
        prod_q = resXX[:, off_it + p * Q: off_it + p * Q + 1]
        for q in range(1, Q):
            prod_q = prod_q * resXX[:, off_it + p * Q + q: off_it + p * Q + q + 1]
        it_sum = it_sum + prod_q

    # sum_m (1 - 2*(gX_m + X) + 4*gX_m*X) * kap_m
    kap_elb = k_sum - 2.0 * w_kap - 2.0 * X * k_sum + 4.0 * X * w_kap

    elb_rows = (b0 + jnp.sum(XX_, axis=1, keepdims=True) * b1 + it_sum * b2) \
        * jnp.exp(row_lsum)
    elb_rows = elb_rows + jnp.sum(
        coef * (1.0 + 4.0 * X * XT - 2.0 * (X + XT)) * Mb, axis=1, keepdims=True)
    elb_rows = elb_rows + jnp.sum(kap_elb * Mb, axis=1, keepdims=True)
    elb_rows = elb_rows - T * jnp.sum(
        (X * jnp.log(X + EPS) + X_ * lX_) * Mb, axis=1, keepdims=True)
    elb_rows_ref[...] = elb_rows


def _one_hot_last(idx, n):
    return (idx[..., None] == jnp.arange(n, dtype=idx.dtype)).astype(jnp.float32)


def mfa_precompute(consts, b, onehot_dtype=jnp.bfloat16):
    """One-hot / count construction (index data only, independent of X).

    Hoisted out of the per-forward path: compute once per b-slice and reuse.
    j-axis layout of the concatenated tensor OH (N_i, J, N_k):
      [0,             M*N)  : OH_ij   [i, m*N+j, k] = [idx_ij[i,j,m,b]   == k]
      [M*N,      (M+Mc)*N)  : OH_ijF  [i, m*N+j, k] = [idx_ijF[i,j,m,b]  == k]
      [(M+Mc)*N,(M+2Mc)*N)  : CNT_ijT [i, m*N+j, k] = #{q: idx_ijT[i,j,m,q,b]==k}
      [(M+2Mc)*N,  .. +P*Q) : OH_iT   [i, p*Q+q, k] = [idx_iT[i,p,q,b]   == k]
    """
    D, C, S, mask, idx_iT, idx_ij, idx_ijF, idx_ijT = consts
    N = D.shape[0]
    M = idx_ij.shape[2]
    Mc = idx_ijF.shape[2]
    P = idx_iT.shape[1]
    Q = idx_iT.shape[2]

    p0 = jnp.transpose(_one_hot_last(idx_ij[:, :, :, b], N),
                       (0, 2, 1, 3)).reshape(N, M * N, N)
    p1 = jnp.transpose(_one_hot_last(idx_ijF[:, :, :, b], N),
                       (0, 2, 1, 3)).reshape(N, Mc * N, N)
    p2 = jnp.transpose(jnp.sum(_one_hot_last(idx_ijT[:, :, :, :, b], N), axis=3),
                       (0, 2, 1, 3)).reshape(N, Mc * N, N)
    p3 = _one_hot_last(idx_iT[:, :, :, b], N).reshape(N, P * Q, N)
    oh_big = jnp.concatenate([p0, p1, p2, p3], axis=1).astype(onehot_dtype)

    return dict(Db=D[:, :, b], Cb=C[:, :, b], Sb=S[:, :, b], Mb=mask[:, :, b],
                oh_big=oh_big, dims=(M, Mc, P, Q))


def mfa_forward(X, T, params, precomp, tile_rows=None):
    b0, b1, b2, lam, eta, nu, mu, kap = params
    N = X.shape[0]
    M, Mc, P, Q = precomp["dims"]
    oh_big = precomp["oh_big"]
    J = oh_big.shape[1]

    if tile_rows is None:
        if N % 8 == 0:
            tile_rows = min(N, 128)
            while N % tile_rows:
                tile_rows -= 8
        else:
            tile_rows = N
    assert N % tile_rows == 0
    grid = (N // tile_rows,)

    params_arr = jnp.concatenate([
        jnp.stack([b0, b1, b2, lam, eta, nu, mu]).reshape(-1),
        jnp.asarray(T, dtype=jnp.float32).reshape(1),
        kap.reshape(-1),
    ]).reshape(1, -1).astype(jnp.float32)

    kernel = functools.partial(mfa_kernel, M=M, Mc=Mc, P=P, Q=Q)
    row2d = lambda i: (i, 0)

    elb_rows, gamma_sig = pl.pallas_call(
        kernel,
        grid=grid,
        out_shape=(jax.ShapeDtypeStruct((N, 1), jnp.float32),   # per-row elb partials
                   jax.ShapeDtypeStruct((N, N), jnp.float32)),  # sigmoid(gamma / T)
        in_specs=[
            pl.BlockSpec(memory_space=pltpu.MemorySpace.SMEM),      # scalar params
            pl.BlockSpec((tile_rows, N), row2d),                    # X rows
            pl.BlockSpec((tile_rows, N), row2d),                    # X^T rows
            pl.BlockSpec((tile_rows, N), row2d),                    # D[:,:,b]
            pl.BlockSpec((tile_rows, N), row2d),                    # C[:,:,b]
            pl.BlockSpec((tile_rows, N), row2d),                    # S[:,:,b]
            pl.BlockSpec((tile_rows, N), row2d),                    # mask[:,:,b]
            pl.BlockSpec((tile_rows, J, N), lambda i: (i, 0, 0)),   # one-hots (bf16)
        ],
        out_specs=(pl.BlockSpec((tile_rows, 1), row2d),
                   pl.BlockSpec((tile_rows, N), row2d)),
        compiler_params=pltpu.CompilerParams(
            dimension_semantics=("parallel",),
            vmem_limit_bytes=32 * 1024 * 1024),
    )(params_arr, X, X.T, precomp["Db"], precomp["Cb"], precomp["Sb"],
      precomp["Mb"], oh_big)

    return jnp.sum(elb_rows), gamma_sig


def mfa_reference(X, T, b, params, consts):
    """Pure-JAX reference mirroring the PyTorch forward semantics."""
    D, C, S, mask, idx_iT, idx_ij, idx_ijF, idx_ijT = consts
    b0, b1, b2, lam, eta, nu, mu, kap = params
    b0, b1, b2, lam, eta, nu, mu = (b0[0], b1[0], b2[0], lam[0], eta[0], nu[0], mu[0])
    N = X.shape[0]
    X_ = 1.0 - X + EPS
    XT = X.T
    lX_ = jnp.log(X_)
    tmp0 = jnp.exp(jnp.sum(lX_, 1, keepdims=True) - lX_)
    XX_ = X / X_
    ij = idx_ij[:, :, :, b]
    ijF = idx_ijF[:, :, :, b]
    ijT = idx_ijT[:, :, :, :, b]
    iT = idx_iT[:, :, :, b]
    r1 = jnp.arange(N)[:, None, None]
    r2 = jnp.arange(N)[:, None, None, None]

    gXX_ij = XX_[r1, ij]
    gX_ij = X[r1, ij]
    locUp0 = jnp.sum(gXX_ij, 2)
    locUp1 = jnp.sum(XX_[r1, ijF] * jnp.sum(XX_[r2, ijT], 3), 2)
    Db, Cb, Sb, Mb = D[:, :, b], C[:, :, b], S[:, :, b], mask[:, :, b]
    coef = lam + eta * Db + nu * Cb + mu * Sb
    gamma = (b1 - b0 + (b2 - b1) * locUp0 - b2 * locUp1) * tmp0
    gamma = gamma + (4 * XT - 2) * coef + 100 * (Mb - 1) + jnp.sum((4 * gX_ij - 2) * kap[0], 2)

    gXX_iT = XX_[jnp.arange(N)[:, None, None], iT]
    elb = b0 + jnp.sum(XX_, 1) * b1 + jnp.sum(jnp.prod(gXX_iT, 2), 1) * b2
    elb = jnp.sum(elb * jnp.exp(jnp.sum(lX_, 1)))
    elb = elb + jnp.sum(coef * (1 + 4 * X * XT - 2 * (X + XT)) * Mb)
    elb = elb + jnp.sum(
        jnp.sum((1 - 2 * (gX_ij + X[:, :, None]) + 4 * gX_ij * X[:, :, None]) * kap[0], 2) * Mb)
    elb = elb - T * jnp.sum((X * jnp.log(X + EPS) + X_ * lX_) * Mb)
    return elb, 1.0 / (1.0 + jnp.exp(-(gamma / T)))


if __name__ == "__main__":
    N = 16                      # args.nodes
    deg = 4                     # args.degree
    B = 2                       # number of precomputed "b" slices
    b = 1                       # which slice to run
    num_layers = 3              # args.layers
    temp = 2.0                  # args.temp
    M = deg - 2
    num_comb = int(comb(deg - 2, deg - 3))    # = deg - 2
    num_comb_i = int(comb(deg - 1, 2))
    Q = 2                       # pair indices in idx_iT (torch.prod over this axis)
    Q2 = deg - 3                # summed axis in idx_ijT

    T_vec = temp ** jnp.arange(num_layers - 1, -1, -1, dtype=jnp.float32)
    T = float(T_vec[1])

    key = jax.random.PRNGKey(0)
    keys = jax.random.split(key, 16)
    X = jax.random.uniform(keys[0], (N, N), jnp.float32, 0.05, 0.95)
    D = 1.0 / (1.0 + jax.random.uniform(keys[1], (N, N, B), jnp.float32))
    C = jax.random.uniform(keys[2], (N, N, B), jnp.float32)
    S = jax.random.uniform(keys[3], (N, N, B), jnp.float32)
    mask = (jax.random.uniform(keys[4], (N, N, B)) < 0.7).astype(jnp.float32)
    # TODO(synk): the original idx_* tensors come from graph structure built
    # outside the module; synthetic valid indices are used here instead.
    idx_iT = jax.random.randint(keys[5], (N, num_comb_i, Q, B), 0, N)
    idx_ij = jax.random.randint(keys[6], (N, N, M, B), 0, N)
    idx_ijF = jax.random.randint(keys[7], (N, N, num_comb, B), 0, N)
    idx_ijT = jax.random.randint(keys[8], (N, N, num_comb, Q2, B), 0, N)

    b0 = jax.random.uniform(keys[9], (1,), jnp.float32)
    b1 = jax.random.uniform(keys[10], (1,), jnp.float32)
    b2 = jax.random.uniform(keys[11], (1,), jnp.float32)
    lam = jax.random.uniform(keys[12], (1,), jnp.float32)
    eta = jax.random.uniform(keys[13], (1,), jnp.float32)
    nu = jax.random.uniform(keys[14], (1,), jnp.float32)
    mu = jax.random.uniform(keys[15], (1,), jnp.float32)
    kap = jax.random.uniform(jax.random.PRNGKey(1), (1, deg - 2), jnp.float32)

    params = (b0, b1, b2, lam, eta, nu, mu, kap)
    consts = (D, C, S, mask, idx_iT, idx_ij, idx_ijF, idx_ijT)

    # one-hot / count construction hoisted out of the per-forward path
    precomp = mfa_precompute(consts, b)
    precomp["oh_big"] = jax.block_until_ready(precomp["oh_big"])

    # tile_rows=8 -> grid of 2 row-tiles (exercises the parallel grid path)
    elb, gamma_sig = mfa_forward(X, T, params, precomp, tile_rows=8)
    elb = jax.block_until_ready(elb)
    gamma_sig = jax.block_until_ready(gamma_sig)

    elb_ref, gamma_ref = mfa_reference(X, T, b, params, consts)
    assert jnp.all(jnp.isfinite(gamma_sig)) and bool(jnp.isfinite(elb))
    assert jnp.allclose(elb, elb_ref, rtol=1e-2, atol=1e-2), (float(elb), float(elb_ref))
    assert jnp.allclose(gamma_sig, gamma_ref, rtol=1e-2, atol=1e-2)
    print("KERNEL_OK")
</pallas_src>

<mosaic_0001>
module attributes {stable_mosaic.version = 11 : i64} {
  func.func @mfa_kernel(%arg0: i32, %arg1: memref<1x10xf32, #tpu.memory_space<smem>>, %arg2: memref<8x16xf32, #tpu.memory_space<vmem>>, %arg3: memref<8x16xf32, #tpu.memory_space<vmem>>, %arg4: memref<8x16xf32, #tpu.memory_space<vmem>>, %arg5: memref<8x16xf32, #tpu.memory_space<vmem>>, %arg6: memref<8x16xf32, #tpu.memory_space<vmem>>, %arg7: memref<8x16xf32, #tpu.memory_space<vmem>>, %arg8: memref<8x102x16xbf16, #tpu.memory_space<vmem>>, %arg9: memref<8x1xf32, #tpu.memory_space<vmem>>, %arg10: memref<8x16xf32, #tpu.memory_space<vmem>>) attributes {dimension_semantics = [#tpu.dimension_semantics<parallel>], iteration_bounds = array<i64: 2>, scalar_prefetch = 0 : i64, scratch_operands = 0 : i64, tpu.core_type = #tpu.core_type<tc>, window_params = [{transform_indices = @transform_0, window_bounds = array<i64: 1, 10>}, {transform_indices = @transform_1, window_bounds = array<i64: 8, 16>}, {transform_indices = @transform_2, window_bounds = array<i64: 8, 16>}, {transform_indices = @transform_3, window_bounds = array<i64: 8, 16>}, {transform_indices = @transform_4, window_bounds = array<i64: 8, 16>}, {transform_indices = @transform_5, window_bounds = array<i64: 8, 16>}, {transform_indices = @transform_6, window_bounds = array<i64: 8, 16>}, {transform_indices = @transform_7, window_bounds = array<i64: 8, 102, 16>}, {transform_indices = @transform_8, window_bounds = array<i64: 8, 1>}, {transform_indices = @transform_9, window_bounds = array<i64: 8, 16>}]} {
    %c0 = arith.constant 0 : index
    %c0_0 = arith.constant 0 : index
    %0 = memref.load %arg1[%c0, %c0_0] : memref<1x10xf32, #tpu.memory_space<smem>>
    %c0_1 = arith.constant 0 : index
    %c1 = arith.constant 1 : index
    %1 = memref.load %arg1[%c0_1, %c1] : memref<1x10xf32, #tpu.memory_space<smem>>
    %c0_2 = arith.constant 0 : index
    %c2 = arith.constant 2 : index
    %2 = memref.load %arg1[%c0_2, %c2] : memref<1x10xf32, #tpu.memory_space<smem>>
    %c0_3 = arith.constant 0 : index
    %c3 = arith.constant 3 : index
    %3 = memref.load %arg1[%c0_3, %c3] : memref<1x10xf32, #tpu.memory_space<smem>>
    %c0_4 = arith.constant 0 : index
    %c4 = arith.constant 4 : index
    %4 = memref.load %arg1[%c0_4, %c4] : memref<1x10xf32, #tpu.memory_space<smem>>
    %c0_5 = arith.constant 0 : index
    %c5 = arith.constant 5 : index
    %5 = memref.load %arg1[%c0_5, %c5] : memref<1x10xf32, #tpu.memory_space<smem>>
    %c0_6 = arith.constant 0 : index
    %c6 = arith.constant 6 : index
    %6 = memref.load %arg1[%c0_6, %c6] : memref<1x10xf32, #tpu.memory_space<smem>>
    %c0_7 = arith.constant 0 : index
    %c7 = arith.constant 7 : index
    %7 = memref.load %arg1[%c0_7, %c7] : memref<1x10xf32, #tpu.memory_space<smem>>
    %c0_8 = arith.constant 0 : index
    %c0_9 = arith.constant 0 : index
    %8 = vector.load %arg2[%c0_8, %c0_9] : memref<8x16xf32, #tpu.memory_space<vmem>>, vector<8x16xf32>
    %c0_10 = arith.constant 0 : index
    %c0_11 = arith.constant 0 : index
    %9 = vector.load %arg3[%c0_10, %c0_11] : memref<8x16xf32, #tpu.memory_space<vmem>>, vector<8x16xf32>
    %c0_12 = arith.constant 0 : index
    %c0_13 = arith.constant 0 : index
    %10 = vector.load %arg4[%c0_12, %c0_13] : memref<8x16xf32, #tpu.memory_space<vmem>>, vector<8x16xf32>
    %c0_14 = arith.constant 0 : index
    %c0_15 = arith.constant 0 : index
    %11 = vector.load %arg5[%c0_14, %c0_15] : memref<8x16xf32, #tpu.memory_space<vmem>>, vector<8x16xf32>
    %c0_16 = arith.constant 0 : index
    %c0_17 = arith.constant 0 : index
    %12 = vector.load %arg6[%c0_16, %c0_17] : memref<8x16xf32, #tpu.memory_space<vmem>>, vector<8x16xf32>
    %c0_18 = arith.constant 0 : index
    %c0_19 = arith.constant 0 : index
    %13 = vector.load %arg7[%c0_18, %c0_19] : memref<8x16xf32, #tpu.memory_space<vmem>>, vector<8x16xf32>
    %cst = arith.constant 1.000000e+00 : f32
    %14 = vector.broadcast %cst : f32 to vector<8x16xf32>
    %15 = arith.subf %14, %8 : vector<8x16xf32>
    %cst_20 = arith.constant 1.000000e-16 : f32
    %16 = vector.broadcast %cst_20 : f32 to vector<8x16xf32>
    %17 = arith.addf %15, %16 : vector<8x16xf32>
    %18 = math.log %17 : vector<8x16xf32>
    %cst_21 = arith.constant dense<0.000000e+00> : vector<8xf32>
    %19 = vector.multi_reduction <add>, %18, %cst_21 [1] : vector<8x16xf32> to vector<8xf32>
    %20 = vector.shape_cast %19 : vector<8xf32> to vector<8x1xf32>
    %21 = vector.broadcast %20 : vector<8x1xf32> to vector<8x16xf32>
    %22 = arith.subf %21, %18 : vector<8x16xf32>
    %23 = math.exp %22 : vector<8x16xf32>
    %24 = arith.divf %8, %17 : vector<8x16xf32>
    %25 = arith.truncf %24 : vector<8x16xf32> to vector<8x16xbf16>
    %26 = vector.shape_cast %25 : vector<8x16xbf16> to vector<8x1x16xbf16>
    %c0_22 = arith.constant 0 : index
    %c0_23 = arith.constant 0 : index
    %c0_24 = arith.constant 0 : index
    %27 = vector.load %arg8[%c0_22, %c0_23, %c0_24] : memref<8x102x16xbf16, #tpu.memory_space<vmem>>, vector<8x102x16xbf16>
    "tpu.trace_start"() <{level = 10 : i32, message = "bqd,bkd->bqk"}> : () -> ()
    %cst_25 = arith.constant dense<0.000000e+00> : vector<8x1x102xf32>
    %28 = tpu.matmul %26, %27, %cst_25 {dimension_numbers = #tpu.dot_dimension_numbers<[2], [2], [1], [1], [0, 0, 0, 1, 1, 1], [0], [0]>} : vector<8x1x16xbf16>, vector<8x102x16xbf16>, vector<8x1x102xf32> -> vector<8x1x102xf32>
    "tpu.trace_stop"() : () -> ()
    %29 = vector.shape_cast %28 : vector<8x1x102xf32> to vector<8x102xf32>
    %cst_26 = arith.constant 0.000000e+00 : f32
    %30 = vector.broadcast %cst_26 : f32 to vector<8x16xf32>
    %cst_27 = arith.constant 0.000000e+00 : f32
    %31 = vector.broadcast %cst_27 : f32 to vector<8x16xf32>
    %c0_28 = arith.constant 0 : index
    %c8 = arith.constant 8 : index
    %32 = memref.load %arg1[%c0_28, %c8] : memref<1x10xf32, #tpu.memory_space<smem>>
    %cst_29 = arith.constant 0.000000e+00 : f32
    %33 = arith.addf %cst_29, %32 : f32
    %34 = vector.extract_strided_slice %29 {offsets = [0, 0], sizes = [8, 16], strides = [1, 1]} : vector<8x102xf32> to vector<8x16xf32>
    %35 = arith.addf %30, %34 : vector<8x16xf32>
    %cst_30 = arith.constant 1.000000e+00 : f32
    %36 = vector.broadcast %cst_30 : f32 to vector<8x16xf32>
    %37 = arith.addf %36, %34 : vector<8x16xf32>
    %38 = arith.divf %34, %37 : vector<8x16xf32>
    %39 = vector.broadcast %32 : f32 to vector<8x16xf32>
    %40 = arith.mulf %39, %38 : vector<8x16xf32>
    %41 = arith.addf %31, %40 : vector<8x16xf32>
    %c0_31 = arith.constant 0 : index
    %c9 = arith.constant 9 : index
    %42 = memref.load %arg1[%c0_31, %c9] : memref<1x10xf32, #tpu.memory_space<smem>>
    %43 = arith.addf %33, %42 : f32
    %44 = vector.extract_strided_slice %29 {offsets = [0, 16], sizes = [8, 16], strides = [1, 1]} : vector<8x102xf32> to vector<8x16xf32>
    %45 = arith.addf %35, %44 : vector<8x16xf32>
    %cst_32 = arith.constant 1.000000e+00 : f32
    %46 = vector.broadcast %cst_32 : f32 to vector<8x16xf32>
    %47 = arith.addf %46, %44 : vector<8x16xf32>
    %48 = arith.divf %44, %47 : vector<8x16xf32>
    %49 = vector.broadcast %42 : f32 to vector<8x16xf32>
    %50 = arith.mulf %49, %48 : vector<8x16xf32>
    %51 = arith.addf %41, %50 : vector<8x16xf32>
    %cst_33 = arith.constant 0.000000e+00 : f32
    %52 = vector.broadcast %cst_33 : f32 to vector<8x16xf32>
    %53 = vector.extract_strided_slice %29 {offsets = [0, 32], sizes = [8, 16], strides = [1, 1]} : vector<8x102xf32> to vector<8x16xf32>
    %54 = vector.extract_strided_slice %29 {offsets = [0, 64], sizes = [8, 16], strides = [1, 1]} : vector<8x102xf32> to vector<8x16xf32>
    %55 = arith.mulf %53, %54 : vector<8x16xf32>
    %56 = arith.addf %52, %55 : vector<8x16xf32>
    %57 = vector.extract_strided_slice %29 {offsets = [0, 48], sizes = [8, 16], strides = [1, 1]} : vector<8x102xf32> to vector<8x16xf32>
    %58 = vector.extract_strided_slice %29 {offsets = [0, 80], sizes = [8, 16], strides = [1, 1]} : vector<8x102xf32> to vector<8x16xf32>
    %59 = arith.mulf %57, %58 : vector<8x16xf32>
    %60 = arith.addf %56, %59 : vector<8x16xf32>
    %61 = vector.broadcast %4 : f32 to vector<8x16xf32>
    %62 = arith.mulf %61, %10 : vector<8x16xf32>
    %63 = vector.broadcast %3 : f32 to vector<8x16xf32>
    %64 = arith.addf %63, %62 : vector<8x16xf32>
    %65 = vector.broadcast %5 : f32 to vector<8x16xf32>
    %66 = arith.mulf %65, %11 : vector<8x16xf32>
    %67 = arith.addf %64, %66 : vector<8x16xf32>
    %68 = vector.broadcast %6 : f32 to vector<8x16xf32>
    %69 = arith.mulf %68, %12 : vector<8x16xf32>
    %70 = arith.addf %67, %69 : vector<8x16xf32>
    %71 = arith.subf %1, %0 : f32
    %72 = arith.subf %2, %1 : f32
    %73 = vector.broadcast %72 : f32 to vector<8x16xf32>
    %74 = arith.mulf %73, %45 : vector<8x16xf32>
    %75 = vector.broadcast %71 : f32 to vector<8x16xf32>
    %76 = arith.addf %75, %74 : vector<8x16xf32>
    %77 = vector.broadcast %2 : f32 to vector<8x16xf32>
    %78 = arith.mulf %77, %60 : vector<8x16xf32>
    %79 = arith.subf %76, %78 : vector<8x16xf32>
    %80 = arith.mulf %79, %23 : vector<8x16xf32>
    %cst_34 = arith.constant 4.000000e+00 : f32
    %81 = vector.broadcast %cst_34 : f32 to vector<8x16xf32>
    %82 = arith.mulf %81, %9 : vector<8x16xf32>
    %cst_35 = arith.constant 2.000000e+00 : f32
    %83 = vector.broadcast %cst_35 : f32 to vector<8x16xf32>
    %84 = arith.subf %82, %83 : vector<8x16xf32>
    %85 = arith.mulf %84, %70 : vector<8x16xf32>
    %86 = arith.addf %80, %85 : vector<8x16xf32>
    %cst_36 = arith.constant 1.000000e+00 : f32
    %87 = vector.broadcast %cst_36 : f32 to vector<8x16xf32>
    %88 = arith.subf %13, %87 : vector<8x16xf32>
    %cst_37 = arith.constant 1.000000e+02 : f32
    %89 = vector.broadcast %cst_37 : f32 to vector<8x16xf32>
    %90 = arith.mulf %89, %88 : vector<8x16xf32>
    %91 = arith.addf %86, %90 : vector<8x16xf32>
    %cst_38 = arith.constant 4.000000e+00 : f32
    %92 = vector.broadcast %cst_38 : f32 to vector<8x16xf32>
    %93 = arith.mulf %92, %51 : vector<8x16xf32>
    %cst_39 = arith.constant 2.000000e+00 : f32
    %94 = arith.mulf %cst_39, %43 : f32
    %95 = vector.broadcast %94 : f32 to vector<8x16xf32>
    %96 = arith.subf %93, %95 : vector<8x16xf32>
    %97 = arith.addf %91, %96 : vector<8x16xf32>
    %98 = vector.broadcast %7 : f32 to vector<8x16xf32>
    %99 = arith.divf %97, %98 : vector<8x16xf32>
    %cst_40 = arith.constant 0.000000e+00 : f32
    %100 = vector.broadcast %cst_40 : f32 to vector<8x16xf32>
    %101 = arith.subf %100, %99 : vector<8x16xf32>
    %102 = math.exp %101 : vector<8x16xf32>
    %cst_41 = arith.constant 1.000000e+00 : f32
    %103 = vector.broadcast %cst_41 : f32 to vector<8x16xf32>
    %104 = arith.addf %103, %102 : vector<8x16xf32>
    %105 = tpu.reciprocal %104 {approx = true} : vector<8x16xf32> -> vector<8x16xf32>
    %c0_42 = arith.constant 0 : index
    %c0_43 = arith.constant 0 : index
    %106 = vector.load %arg10[%c0_42, %c0_43] : memref<8x16xf32, #tpu.memory_space<vmem>>, vector<8x16xf32>
    tpu.vector_store %arg10[%c0_42, %c0_43], %105 {strides = array<i32>} : memref<8x16xf32, #tpu.memory_space<vmem>>, vector<8x16xf32>,
    %cst_44 = arith.constant 0.000000e+00 : f32
    %107 = vector.broadcast %cst_44 : f32 to vector<8x1xf32>
    %108 = vector.extract_strided_slice %29 {offsets = [0, 96], sizes = [8, 1], strides = [1, 1]} : vector<8x102xf32> to vector<8x1xf32>
    %109 = vector.extract_strided_slice %29 {offsets = [0, 97], sizes = [8, 1], strides = [1, 1]} : vector<8x102xf32> to vector<8x1xf32>
    %110 = arith.mulf %108, %109 : vector<8x1xf32>
    %111 = arith.addf %107, %110 : vector<8x1xf32>
    %112 = vector.extract_strided_slice %29 {offsets = [0, 98], sizes = [8, 1], strides = [1, 1]} : vector<8x102xf32> to vector<8x1xf32>
    %113 = vector.extract_strided_slice %29 {offsets = [0, 99], sizes = [8, 1], strides = [1, 1]} : vector<8x102xf32> to vector<8x1xf32>
    %114 = arith.mulf %112, %113 : vector<8x1xf32>
    %115 = arith.addf %111, %114 : vector<8x1xf32>
    %116 = vector.extract_strided_slice %29 {offsets = [0, 100], sizes = [8, 1], strides = [1, 1]} : vector<8x102xf32> to vector<8x1xf32>
    %117 = vector.extract_strided_slice %29 {offsets = [0, 101], sizes = [8, 1], strides = [1, 1]} : vector<8x102xf32> to vector<8x1xf32>
    %118 = arith.mulf %116, %117 : vector<8x1xf32>
    %119 = arith.addf %115, %118 : vector<8x1xf32>
    %cst_45 = arith.constant 2.000000e+00 : f32
    %120 = vector.broadcast %cst_45 : f32 to vector<8x16xf32>
    %121 = arith.mulf %120, %51 : vector<8x16xf32>
    %122 = vector.broadcast %43 : f32 to vector<8x16xf32>
    %123 = arith.subf %122, %121 : vector<8x16xf32>
    %cst_46 = arith.constant 2.000000e+00 : f32
    %124 = vector.broadcast %cst_46 : f32 to vector<8x16xf32>
    %125 = arith.mulf %124, %8 : vector<8x16xf32>
    %126 = vector.broadcast %43 : f32 to vector<8x16xf32>
    %127 = arith.mulf %125, %126 : vector<8x16xf32>
    %128 = arith.subf %123, %127 : vector<8x16xf32>
    %cst_47 = arith.constant 4.000000e+00 : f32
    %129 = vector.broadcast %cst_47 : f32 to vector<8x16xf32>
    %130 = arith.mulf %129, %8 : vector<8x16xf32>
    %131 = arith.mulf %130, %51 : vector<8x16xf32>
    %132 = arith.addf %128, %131 : vector<8x16xf32>
    %cst_48 = arith.constant dense<0.000000e+00> : vector<8xf32>
    %133 = vector.multi_reduction <add>, %24, %cst_48 [1] : vector<8x16xf32> to vector<8xf32>
    %134 = vector.shape_cast %133 : vector<8xf32> to vector<8x1xf32>
    %135 = vector.broadcast %1 : f32 to vector<8x1xf32>
    %136 = arith.mulf %134, %135 : vector<8x1xf32>
    %137 = vector.broadcast %0 : f32 to vector<8x1xf32>
    %138 = arith.addf %137, %136 : vector<8x1xf32>
    %139 = vector.broadcast %2 : f32 to vector<8x1xf32>
    %140 = arith.mulf %119, %139 : vector<8x1xf32>
    %141 = arith.addf %138, %140 : vector<8x1xf32>
    %142 = math.exp %20 : vector<8x1xf32>
    %143 = arith.mulf %141, %142 : vector<8x1xf32>
    %cst_49 = arith.constant 4.000000e+00 : f32
    %144 = vector.broadcast %cst_49 : f32 to vector<8x16xf32>
    %145 = arith.mulf %144, %8 : vector<8x16xf32>
    %146 = arith.mulf %145, %9 : vector<8x16xf32>
    %cst_50 = arith.constant 1.000000e+00 : f32
    %147 = vector.broadcast %cst_50 : f32 to vector<8x16xf32>
    %148 = arith.addf %147, %146 : vector<8x16xf32>
    %149 = arith.addf %8, %9 : vector<8x16xf32>
    %cst_51 = arith.constant 2.000000e+00 : f32
    %150 = vector.broadcast %cst_51 : f32 to vector<8x16xf32>
    %151 = arith.mulf %150, %149 : vector<8x16xf32>
    %152 = arith.subf %148, %151 : vector<8x16xf32>
    %153 = arith.mulf %70, %152 : vector<8x16xf32>
    %154 = arith.mulf %153, %13 : vector<8x16xf32>
    %cst_52 = arith.constant dense<0.000000e+00> : vector<8xf32>
    %155 = vector.multi_reduction <add>, %154, %cst_52 [1] : vector<8x16xf32> to vector<8xf32>
    %156 = vector.shape_cast %155 : vector<8xf32> to vector<8x1xf32>
    %157 = arith.addf %143, %156 : vector<8x1xf32>
    %158 = arith.mulf %132, %13 : vector<8x16xf32>
    %cst_53 = arith.constant dense<0.000000e+00> : vector<8xf32>
    %159 = vector.multi_reduction <add>, %158, %cst_53 [1] : vector<8x16xf32> to vector<8xf32>
    %160 = vector.shape_cast %159 : vector<8xf32> to vector<8x1xf32>
    %161 = arith.addf %157, %160 : vector<8x1xf32>
    %cst_54 = arith.constant 1.000000e-16 : f32
    %162 = vector.broadcast %cst_54 : f32 to vector<8x16xf32>
    %163 = arith.addf %8, %162 : vector<8x16xf32>
    %164 = math.log %163 : vector<8x16xf32>
    %165 = arith.mulf %8, %164 : vector<8x16xf32>
    %166 = arith.mulf %17, %18 : vector<8x16xf32>
    %167 = arith.addf %165, %166 : vector<8x16xf32>
    %168 = arith.mulf %167, %13 : vector<8x16xf32>
    %cst_55 = arith.constant dense<0.000000e+00> : vector<8xf32>
    %169 = vector.multi_reduction <add>, %168, %cst_55 [1] : vector<8x16xf32> to vector<8xf32>
    %170 = vector.shape_cast %169 : vector<8xf32> to vector<8x1xf32>
    %171 = vector.broadcast %7 : f32 to vector<8x1xf32>
    %172 = arith.mulf %171, %170 : vector<8x1xf32>
    %173 = arith.subf %161, %172 : vector<8x1xf32>
    %c0_56 = arith.constant 0 : index
    %c0_57 = arith.constant 0 : index
    %174 = vector.load %arg9[%c0_56, %c0_57] : memref<8x1xf32, #tpu.memory_space<vmem>>, vector<8x1xf32>
    tpu.vector_store %arg9[%c0_56, %c0_57], %173 {strides = array<i32>} : memref<8x1xf32, #tpu.memory_space<vmem>>, vector<8x1xf32>,
    return
  }
  func.func @transform_0(%arg0: i32) -> (i32, i32) {
    %c0_i32 = arith.constant 0 : i32
    %c0_i32_0 = arith.constant 0 : i32
    %c0_i32_1 = arith.constant 0 : i32
    return %c0_i32, %c0_i32_0 : i32, i32
  }
  func.func @transform_1(%arg0: i32) -> (i32, i32) {
    %c0_i32 = arith.constant 0 : i32
    %c0_i32_0 = arith.constant 0 : i32
    return %arg0, %c0_i32 : i32, i32
  }
  func.func @transform_2(%arg0: i32) -> (i32, i32) {
    %c0_i32 = arith.constant 0 : i32
    %c0_i32_0 = arith.constant 0 : i32
    return %arg0, %c0_i32 : i32, i32
  }
  func.func @transform_3(%arg0: i32) -> (i32, i32) {
    %c0_i32 = arith.constant 0 : i32
    %c0_i32_0 = arith.constant 0 : i32
    return %arg0, %c0_i32 : i32, i32
  }
  func.func @transform_4(%arg0: i32) -> (i32, i32) {
    %c0_i32 = arith.constant 0 : i32
    %c0_i32_0 = arith.constant 0 : i32
    return %arg0, %c0_i32 : i32, i32
  }
  func.func @transform_5(%arg0: i32) -> (i32, i32) {
    %c0_i32 = arith.constant 0 : i32
    %c0_i32_0 = arith.constant 0 : i32
    return %arg0, %c0_i32 : i32, i32
  }
  func.func @transform_6(%arg0: i32) -> (i32, i32) {
    %c0_i32 = arith.constant 0 : i32
    %c0_i32_0 = arith.constant 0 : i32
    return %arg0, %c0_i32 : i32, i32
  }
  func.func @transform_7(%arg0: i32) -> (i32, i32, i32) {
    %c0_i32 = arith.constant 0 : i32
    %c0_i32_0 = arith.constant 0 : i32
    %c0_i32_1 = arith.constant 0 : i32
    return %arg0, %c0_i32, %c0_i32_0 : i32, i32, i32
  }
  func.func @transform_8(%arg0: i32) -> (i32, i32) {
    %c0_i32 = arith.constant 0 : i32
    %c0_i32_0 = arith.constant 0 : i32
    return %arg0, %c0_i32 : i32, i32
  }
  func.func @transform_9(%arg0: i32) -> (i32, i32) {
    %c0_i32 = arith.constant 0 : i32
    %c0_i32_0 = arith.constant 0 : i32
    return %arg0, %c0_i32 : i32, i32
  }
}

</mosaic_0001>

<bundles_post_ra>
// kernel: tpu_custom_call.1
= control target key start
LH: loop header
LB: loop body
LE: loop exit
PB: predicated region body
PF: predicated region fallthrough
CT: control target
= control target key end

     0   :  { %s4064_s0 = inlined_call_operand.vmem [shape: f32[1,10], index: 0, kind: input, shape index: {}]   ;;  %s4065_s1 = inlined_call_operand.vmem [shape: f32[16,16], index: 1, kind: input, shape index: {}]   ;;  %s4066_s2 = inlined_call_operand.vmem [shape: f32[16,16], index: 2, kind: input, shape index: {}]   ;;  %s4067_s3 = inlined_call_operand.vmem [shape: f32[16,16], index: 3, kind: input, shape index: {}]   ;;  %s4068_s4 = inlined_call_operand.vmem [shape: f32[16,16], index: 4, kind: input, shape index: {}]   ;;  %s4069_s5 = inlined_call_operand.vmem [shape: f32[16,16], index: 5, kind: input, shape index: {}]   ;;  %s4070_s6 = inlined_call_operand.vmem [shape: f32[16,16], index: 6, kind: input, shape index: {}]   ;;  %s4071_s7 = inlined_call_operand.vmem [shape: bf16[16,102,16], index: 7, kind: input, shape index: {}]   ;;  %s4072_s8 = inlined_call_operand.vmem [shape: f32[16,1], index: 8, kind: output, shape index: {0}]   ;;  %s4073_s9 = inlined_call_operand.hbm [shape: f32[16,16], index: 9, kind: output, shape index: {1}]  }
   0x1   :  { %4099 = sst [smem:[#allocation27_spill]] %s4064_s0 }
   0x2   :  { %4100 = sst [smem:[#allocation28_spill]] %s4065_s1 }
   0x3   :  { %4101 = sst [smem:[#allocation29_spill]] %s4066_s2 }
   0x4   :  { %15 = vsyncpa [#allocation4], 0 }
   0x5   :  { %16 = vsyncpa [#allocation3], 0 }
   0x6   :  { %18 = vsyncpa [#allocation3 + $0x1], 0  ;;  %s3068_s30 = smov 0   ;;  %s3070_s10 = smov 0  }
   0x7   :  { %s3072_s11 = smov 0   ;;  %s3074_s12 = smov 0  }
   0x8 LB: > { %s3089_s13 = sadd.s32 4294967295, %s3005_s12   ;;  %s2442_s14 = sadd.s32 4294967294, %s3005_s12   ;;  %s3005_s12 = sphi %s3074_s12, %s4166_s12   ;;  %s3001_s11 = sphi %s3072_s11, %s4165_s11   ;;  %s2997_s10 = sphi %s3070_s10, %s4164_s10   ;;  %s2993_s30 = sphi %s3068_s30, %s4163_s30  }
   0x9   : > { %s3093_s15 = sadd.s32 1, %s3005_s12   ;;  %s260_s16 = sadd.s32 1, %s3001_s11 }
   0xa   : > { %s257_s17 = ssub.s32 %s3005_s12, %s3093_s15  ;;  %p270_p0 = scmp.ne.s32.totalorder %s3001_s11, %s2997_s10 }
   0xb   : > { %p258_p1 = scmp.eq.s32.totalorder %s257_s17, 0  ;;  %p271_p2 = scmp.eq.s32.totalorder %s3089_s13, 1 }
   0xc   : > { %p276_p3 = scmp.ne.s32.totalorder %s2997_s10, %s2993_s30  ;;  %p277_p4 = scmp.eq.s32.totalorder %s2442_s14, 1 }
   0xd   : > { %s3104_s18 = scalar_select %p258_p1, %s3001_s11, %s260_s16  }
   0xe   : > { %p3106_p5 = por %p271_p2, %p270_p0  ;;  %p3110_p6 = por %p277_p4, %p276_p3 }
   0xf   : > { %p2443_p7 = scmp.ge.s32.totalorder %s3005_s12, 1  ;;  %p284_p8 = scmp.lt.s32.totalorder %s3005_s12, 3 }
  0x10   : > { %p2764_p9 = scmp.eq.s32.totalorder %s3089_s13, 0  ;;  %s4105_s0 = sld [smem:[#allocation27_spill]] }
  0x11   : > { %p3117_p10 = pnand %p2443_p7, %p284_p8 }
  0x13   : > { %p2756_p11 = pneg %p3117_p10 }
  0x15   : > { %p2757_p12 = pnand %p2764_p9, %p2756_p11 }
  0x16   : > { %s297_s24 = sshll.u32 %s4105_s0, 4  ;;  %s298_s24 = int_to_ptr.vmem [resolvable:$true] %s297_s24 }
  0x17   : > { %s2926_s25 = scalar_lea.vmem %s298_s24, 16  ;;  %p2928_p0 = pneg %p2757_p12 }
  0x18   : > { %p2927_p13 = scmp.ne.s32.totalorder %s298_s24, %s2926_s25  ;;  %p2934_p3 = scmp.lt.s32.totalorder %s298_s24, %s298_s24 }
  0x19   : > { %p2935_p4 = scmp.lt.s32.totalorder %s2926_s25, %s2926_s25 }
  0x1a   : > { %p2929_p1 = pnand %p2928_p0, %p2927_p13 }
  0x1b   : > { %p2936_p7 = por %p2935_p4, %p2934_p3 }
  0x1c   : > { %p2930_p2 = pneg %p2929_p1 }
  0x1e   : > { %p2937_p8 = pnand %p2936_p7, %p2930_p2 }
  0x20   : > { %2940 = shalt.err (!%p2937_p8)
}
  0x21   : > { %s3007_s26 = smov [#allocation2]   ;;  %362 = sbr.rel (%p3117_p10) target bundleno = 904 (0x388), region = 52 }
  0x22   : > { %2759 = dma.vmem_to_smem (!%p2757_p12), %s298_s24, 16, %s3007_s26, [#allocation4]  }
  0x26   : > { %2984 = dma.done.wait (%p2764_p9), [#allocation4], 16  }
  0x27   : > { %2986 = vsyncadd (%p2764_p9), [#allocation4], 4294967280 }
  0x28   : > { %368 = sfence }
  0x29   : > { %s2455_s27 = sshll.u32 %s3089_s13, 3  ;;  %p428_p11 = scmp.lt.s32.totalorder %s3089_s13, 1  ;;  %v3008_v0 = vmov 0.0   ;;  %vm3009_vm0 = vmmov 0   ;;  %vm482_vm1 = vcmask 130048   ;;  %v496_v20 = vlaneseq }
  0x2a   : > { %2605 = vmatprep.subr.bf16.mxu0 %v3008_v0  ;;  %2623 = vmatprep.subr.bf16.mxu1 %v3008_v0  ;;  %p453_p12 = scmp.lt.s32.totalorder %s2455_s27, 15  ;;  %s4106_s1 = sld [smem:[#allocation28_spill]]  ;;  %v3010_v18 = vmov 1966171168   ;;  %vm1908_vm2 = vcmask 1041409   ;;  %vm1911_vm3 = vcmask 1042434  }
  0x2b   : > { %2619 = vmatprep.mubr.msk.bf16.mxu0 %vm3009_vm0, %v3008_v0  ;;  %2637 = vmatprep.mubr.msk.bf16.mxu1 %vm3009_vm0, %v3008_v0  ;;  %s429_s28 = scalar_select %p428_p11, %s3089_s13, 1  ;;  %v494_v19 = vunpack.c.l.s4 %v3010_v18  ;;  %v497_v24 = vshrl.u32 %v496_v20, 7  ;;  %vm1914_vm4 = vcmask 1043459   ;;  %vm1917_vm5 = vcmask 1044484  }
  0x2c   : > { %s4168_s27 = smov (!%p453_p12, %s2455_s27), 15  ;;  %s4074_s25 = smov 96   ;;  %vm1920_vm6 = vcmask 1045509   ;;  %vm1923_vm7 = vcmask 1046534   ;;  %vm1926_vm8 = vcmask 1047559  }
  0x2d   : > { %s2749_s29 = smul.u32 52, %s4168_s27  ;;  %s3150_s21 = sshll.u32 %s429_s28, 3  ;;  %v495_v23 = vunpack.c.0.s8 %v494_v19  ;;  %v3205_v40 = vsub.s32 0, %v497_v24 }
  0x2e   : > { %s3012_s26 = smov 127   ;;  %s3414_s27 = sld [smem:[#allocation2 + $0x9]] }
  0x2f   : > { %s3146_s17 = scalar_lea.vmem %s4071_s7, %s2749_s29  ;;  %v3188_v29 = vsub.s32 %v495_v23, %v497_v24  ;;  %s3013_s28 = smov 112  }
  0x30   : > { %v2809_v1 = vld [vmem:[%s3146_s17 + $0x30] ss:$0 sps:$4 sm:$0x77]   ;;  %v2810_v2 = vld [vmem:[%s3146_s17 + $0x64] ss:$0 sps:$4 sm:$0x77]   ;;  %s3160_s24 = scalar_lea.vmem %s4106_s1, %s3150_s21 }
  0x31   : > { %v689_v3 = vsel %vm482_vm1, %v2809_v1, 0  ;;  %v791_v4 = vsel %vm482_vm1, %v2810_v2, 0  ;;  %v2811_v5 = vld [vmem:[%s3146_s17 + $0x28] sm:$0xff]   ;;  %v2812_v6 = vld [vmem:[%s3146_s17 + $0x5c] sm:$0xff]   ;;  %v2814_v12 = vld [vmem:[%s3146_s17 + $0x54] sm:$0xff]   ;;  %s2533_s29 = sld [smem:[#allocation2 + $0x8]] }
  0x32   : > { %2606 = vmatpush3.bf16.xpose.msra.mxu0 %v689_v3  ;;  %2624 = vmatpush3.bf16.xpose.msra.mxu1 %v791_v4  ;;  %v472_v7 = vld [vmem:[%s3160_s24] sm:$0xff]  ;;  %v686_v8 = vsel %vm482_vm1, %v2811_v5, 0  ;;  %v788_v9 = vsel %vm482_vm1, %v2812_v6, 0  ;;  %v785_v15 = vsel %vm482_vm1, %v2814_v12, 0  ;;  %v2815_v16 = vld [vmem:[%s3146_s17 + $0x18] sm:$0xff]   ;;  %v2816_v17 = vld [vmem:[%s3146_s17 + $0x4c] sm:$0xff]  }
  0x33   : > { %2607 = vmatprep.subr.bf16.mxu0 %v3008_v0  ;;  %2625 = vmatprep.subr.bf16.mxu1 %v3008_v0  ;;  %v478_v10 = vsub.f32 1.0, %v472_v7  ;;  %v2813_v11 = vld [vmem:[%s3146_s17 + $0x20] sm:$0xff]   ;;  %v680_v21 = vsel %vm482_vm1, %v2815_v16, 0  ;;  %v782_v22 = vsel %vm482_vm1, %v2816_v17, 0  ;;  %v2817_v25 = vld [vmem:[%s3146_s17 + $0x10] sm:$0xff]   ;;  %v2819_v34 = vld [vmem:[%s3146_s17 + $0x8] sm:$0xff]  }
  0x34   : > { %v683_v14 = vsel %vm482_vm1, %v2813_v11, 0  ;;  %v2818_v27 = vld [vmem:[%s3146_s17 + $0x44] sm:$0xff]   ;;  %v677_v30 = vsel %vm482_vm1, %v2817_v25, 0  ;;  %v2820_v35 = vld [vmem:[%s3146_s17 + $0x3c] sm:$0xff]   ;;  %v674_v37 = vsel %vm482_vm1, %v2819_v34, 0  ;;  %v2822_v46 = vld [vmem:[%s3146_s17 + $0x34] sm:$0xff]  }
  0x35   : > { %v3171_v13 = vadd.f32 1e-16, %v478_v10  ;;  %v779_v32 = vsel %vm482_vm1, %v2818_v27, 0  ;;  %v776_v39 = vsel %vm482_vm1, %v2820_v35, 0  ;;  %v2821_v43 = vld [vmem:[%s3146_s17] sm:$0xff]   ;;  %v773_v50 = vsel %vm482_vm1, %v2822_v46, 0 }
  0x36   : > { %v671_v48 = vsel %vm482_vm1, %v2821_v43, 0  ;;  %v2823_v52 = vld [vmem:[%s3146_s17 + $0x98] ss:$0 sps:$4 sm:$0x77]   ;;  %v2825_v59 = vld [vmem:[%s3146_s17 + $0x90] sm:$0xff]   ;;  %v2826_v60 = vld [vmem:[%s3146_s17 + $0xc4] sm:$0xff]  }
  0x37   : > { %4107 = vst [vmem:[#allocation8_spill] sm:$0xff] %v3171_v13  ;;  %2865 = vrcp.f32 %v3171_v13  ;;  %v2824_v54 = vld [vmem:[%s3146_s17 + $0xcc] ss:$0 sps:$4 sm:$0x77]   ;;  %v893_v57 = vsel %vm482_vm1, %v2823_v52, 0  ;;  %v890_v61 = vsel %vm482_vm1, %v2825_v59, 0  ;;  %s3528_s14 = sadd.f32 %s3414_s27, %s2533_s29 }
  0x38   : > { %v995_v58 = vsel %vm482_vm1, %v2824_v54, 0  ;;  %v992_v62 = vsel %vm482_vm1, %v2826_v60, 0  ;;  %v2827_v63 = vld [vmem:[%s3146_s17 + $0x88] sm:$0xff]   ;;  %v2828_v1 = vld [vmem:[%s3146_s17 + $0xbc] sm:$0xff]   ;;  %v2830_v5 = vld [vmem:[%s3146_s17 + $0xb4] sm:$0xff]   ;;  %s4076_s22 = smov 124  }
  0x39   : > { %v887_v2 = vsel %vm482_vm1, %v2827_v63, 0  ;;  %v989_v3 = vsel %vm482_vm1, %v2828_v1, 0  ;;  %v2829_v4 = vld [vmem:[%s3146_s17 + $0x80] sm:$0xff]   ;;  %v2832_v10 = vld [vmem:[%s3146_s17 + $0xac] sm:$0xff]   ;;  %v2847_v59 = vld [vmem:[%s3146_s17 + $0xd8] sm:$0xff]   ;;  %s1831_s16 = smul.f32 2.0, %s3528_s14 }
  0x3a   : > { %2608 = vmatpush3.bf16.xpose.msra.mxu0 %v686_v8  ;;  %2626 = vmatpush3.bf16.xpose.msra.mxu1 %v788_v9  ;;  %v884_v6 = vsel %vm482_vm1, %v2829_v4, 0  ;;  %v2831_v8 = vld [vmem:[%s3146_s17 + $0x78] sm:$0xff]   ;;  %v983_v12 = vsel %vm482_vm1, %v2832_v10, 0  ;;  %v2833_v16 = vld [vmem:[%s3146_s17 + $0x70] sm:$0xff]   ;;  %v2834_v17 = vld [vmem:[%s3146_s17 + $0xa4] sm:$0xff]   ;;  %s3623_s23 = sld [smem:[#allocation2 + $0x2]] }
  0x3b   : > { %2609 = vmatprep.subr.bf16.mxu0 %v3008_v0  ;;  %2627 = vmatprep.subr.bf16.mxu1 %v3008_v0  ;;  %v881_v11 = vsel %vm482_vm1, %v2831_v8, 0  ;;  %v980_v23 = vsel %vm482_vm1, %v2834_v17, 0  ;;  %v2835_v25 = vld [vmem:[%s3146_s17 + $0x68] sm:$0xff]   ;;  %v2838_v34 = vld [vmem:[%s3146_s17 + $0x134] ss:$0 sps:$4 sm:$0x77]  }
  0x3c   : > { %v2841_v46 = vld [vmem:[%s3146_s17 + $0xf0] sm:$0xff]   ;;  %v2844_v52 = vld [vmem:[%s3146_s17 + $0x11c] sm:$0xff]   ;;  %v2850_v1 = vld [vmem:[%s3146_s17 + $0x104] sm:$0xff]   ;;  %s4122_s2 = sld [smem:[#allocation29_spill]] }
  0x3d   : > { %v1190_v54 = vsel %vm482_vm1, %v2844_v52, 0  ;;  %v2848_v60 = vld [vmem:[%s3146_s17 + $0x10c] sm:$0xff]   ;;  %v2851_v4 = vld [vmem:[%s3146_s17 + $0x168] ss:$0 sps:$4 sm:$0x77]   ;;  %v2853_v8 = vld [vmem:[%s3146_s17 + $0x160] sm:$0xff]  }
  0x3e   : > { %v2849_v63 = vld [vmem:[%s3146_s17 + $0xd0] sm:$0xff]  }
  0x3f   : > { %v2856_v10 = vld [vmem:[%s3146_s17 + $0x18c] sm:$0xff]  }
  0x42   : > { %2610 = vmatpush3.bf16.xpose.msra.mxu0 %v683_v14  ;;  %2628 = vmatpush3.bf16.xpose.msra.mxu1 %v785_v15 }
  0x43   : > { %2611 = vmatprep.subr.bf16.mxu0 %v3008_v0  ;;  %2629 = vmatprep.subr.bf16.mxu1 %v3008_v0 }
  0x44   : > { %v2866_v26 = vpop.eup %2865 }
  0x45   : > { %v3186_v28 = vmul.f32 %v2866_v26, %v472_v7  ;;  %v986_v7 = vsel %vm482_vm1, %v2830_v5, 0  ;;  %v2836_v26 = vld [vmem:[%s3146_s17 + $0x9c] sm:$0xff]  }
  0x46   : > { %v2852_v5 = vld [vmem:[%s3146_s17 + $0x19c] ss:$0 sps:$4 sm:$0x77]  }
  0x47   : > { %4108 = vst [vmem:[#allocation9_spill] sm:$0xff] %v3186_v28  ;;  %v491_v31 = vpack.c.bf16 %v3186_v28, %v3186_v28 }
  0x49   : > { %v3195_v33 = vrot.slane %v491_v31, %v3188_v29 }
  0x4a   : > { %2612 = vmatpush3.bf16.xpose.msra.mxu0 %v680_v21  ;;  %2630 = vmatpush3.bf16.xpose.msra.mxu1 %v782_v22  ;;  %v878_v22 = vsel %vm482_vm1, %v2833_v16, 0 }
  0x4b   : > { %2613 = vmatprep.subr.bf16.mxu0 %v3008_v0  ;;  %2631 = vmatprep.subr.bf16.mxu1 %v3008_v0  ;;  %v507_v36 = vrot.slane %v3195_v33, %v3188_v29  ;;  %v500_v9 = vcombine.high %v3195_v33, %v3195_v33  ;;  %v2837_v33 = vld [vmem:[%s3146_s17 + $0x100] ss:$0 sps:$4 sm:$0x77]  }
  0x4d   : > { %v515_v38 = vcombine.high %v507_v36, %v507_v36  ;;  %v518_v49 = vunpack.i.h.s16 %v507_v36  ;;  %v2465_v51 = vpack.i.b16 %v507_v36, %v507_v36  ;;  %v514_v14 = vrot.slane %v500_v9, %v3188_v29  ;;  %v2854_v9 = vld [vmem:[%s3146_s17 + $0x194] sm:$0xff]  }
  0x4e   : > { %v875_v29 = vsel %vm482_vm1, %v2835_v25, 0  ;;  %v2861_v25 = vld [vmem:[%s3146_s17 + $0x140] sm:$0xff]  }
  0x4f   : > { %v2499_v41 = vpack.i.b16 %v515_v38, %v515_v38  ;;  %v522_v42 = vunpack.i.h.s16 %v515_v38  ;;  %v731_v53 = vpack.i.b16 %v518_v49, %v518_v49  ;;  %v633_v55 = vrot.slane %v2465_v51, %v3205_v40  ;;  %v2843_v51 = vld [vmem:[%s3146_s17 + $0xe8] sm:$0xff]  }
  0x50   : > { %v516_v15 = vcombine.high %v514_v14, %v514_v14  ;;  %v520_v27 = vunpack.i.h.s16 %v514_v14  ;;  %v2482_v31 = vpack.i.b16 %v514_v14, %v514_v14  ;;  %v1199_v38 = vsel %vm482_vm1, %v2838_v34, 0  ;;  %v2857_v14 = vld [vmem:[%s3146_s17 + $0x150] sm:$0xff]  }
  0x51   : > { %v3209_v44 = vrot.slane %v2499_v41, %v3205_v40  ;;  %v3211_v45 = vpack.i.b16 %v522_v42, %v522_v42  ;;  %v735_v56 = vrot.slane %v731_v53, %v3205_v40  ;;  %v2840_v41 = vld [vmem:[%s3146_s17 + $0x12c] sm:$0xff]   ;;  %v1091_v49 = vsel %vm482_vm1, %v2841_v46, 0 }
  0x52   : > { %2614 = vmatpush3.bf16.xpose.msra.mxu0 %v677_v30  ;;  %2632 = vmatpush3.bf16.xpose.msra.mxu1 %v779_v32  ;;  %v2516_v18 = vpack.i.b16 %v516_v15, %v516_v15  ;;  %v524_v19 = vunpack.i.h.s16 %v516_v15  ;;  %v977_v30 = vsel %vm482_vm1, %v2836_v26, 0  ;;  %v935_v32 = vpack.i.b16 %v520_v27, %v520_v27  ;;  %v2858_v15 = vld [vmem:[%s3146_s17 + $0x184] sm:$0xff]   ;;  %v2862_v26 = vld [vmem:[%s3146_s17 + $0x174] sm:$0xff]  }
  0x53   : > { %2615 = vmatprep.subr.bf16.mxu0 %v3008_v0  ;;  %2633 = vmatprep.subr.bf16.mxu1 %v3008_v0  ;;  %v1143_v47 = vrot.slane %v3211_v45, %v3205_v40  ;;  %v837_v35 = vrot.slane %v2482_v31, %v3205_v40  ;;  %v1196_v43 = vsel %vm482_vm1, %v2840_v41, 0  ;;  %v1088_v53 = vsel %vm482_vm1, %v2843_v51, 0  ;;  %v2864_v31 = vld [vmem:[%s3146_s17 + $0x16c] sm:$0xff]  }
  0x54   : > { %v3266_v20 = vrot.slane %v2516_v18, %v3205_v40  ;;  %v3268_v21 = vpack.i.b16 %v524_v19, %v524_v19  ;;  %v939_v36 = vrot.slane %v935_v32, %v3205_v40  ;;  %v1400_v45 = vsel %vm482_vm1, %v2854_v9, 0  ;;  %v2859_v18 = vld [vmem:[%s3146_s17 + $0x148] sm:$0xff]   ;;  %v2860_v19 = vld [vmem:[%s3146_s17 + $0x17c] sm:$0xff]  }
  0x55   : > { %v1292_v16 = vsel %vm482_vm1, %v2857_v14, 0  ;;  %v1394_v17 = vsel %vm482_vm1, %v2858_v15, 0  ;;  %v1286_v27 = vsel %vm482_vm1, %v2861_v25, 0 }
  0x56   : > { %v1347_v24 = vrot.slane %v3268_v21, %v3205_v40 }
  0x5a   : > { %2616 = vmatpush3.bf16.xpose.msra.mxu0 %v674_v37  ;;  %2634 = vmatpush3.bf16.xpose.msra.mxu1 %v776_v39  ;;  %v1097_v37 = vsel %vm482_vm1, %v2837_v33, 0  ;;  %v2839_v39 = vld [vmem:[%s3146_s17 + $0xf8] sm:$0xff]   ;;  %v1385_v33 = vsel %vm482_vm1, %v2864_v31, 0 }
  0x5b   : > { %2617 = vmatprep.subr.bf16.mxu0 %v3008_v0  ;;  %2635 = vmatprep.subr.bf16.mxu1 %v3008_v0  ;;  %v1094_v42 = vsel %vm482_vm1, %v2839_v39, 0 }
  0x62   : > { %2618 = vmatpush3.bf16.xpose.msra.mxu0 %v671_v48  ;;  %2636 = vmatpush3.bf16.xpose.msra.mxu1 %v773_v50  ;;  %v2842_v48 = vld [vmem:[%s3146_s17 + $0x124] sm:$0xff]  }
  0x63   : > { %2641 = vmatprep.subr.bf16.mxu0 %v3008_v0  ;;  %2659 = vmatprep.subr.bf16.mxu1 %v3008_v0  ;;  %v1193_v50 = vsel %vm482_vm1, %v2842_v48, 0 }
  0x69   : > { %2620 = vmatmul.mubr.msk.bf16.vlgmr.msra.gmra.mxu0 %vm482_vm1, %v633_v55  ;;  %2638 = vmatmul.mubr.msk.bf16.vlgmr.msra.gmra.mxu1 %vm482_vm1, %v735_v56  ;;  %v2845_v55 = vld [vmem:[%s3146_s17 + $0xe0] sm:$0xff]   ;;  %v2846_v56 = vld [vmem:[%s3146_s17 + $0x114] sm:$0xff]  }
  0x6a   : > { %2642 = vmatpush3.bf16.xpose.msra.mxu0 %v893_v57  ;;  %2660 = vmatpush3.bf16.xpose.msra.mxu1 %v995_v58  ;;  %v1085_v57 = vsel %vm482_vm1, %v2845_v55, 0  ;;  %v1187_v58 = vsel %vm482_vm1, %v2846_v56, 0 }
  0x6b   : > { %2643 = vmatprep.subr.bf16.mxu0 %v3008_v0  ;;  %2661 = vmatprep.subr.bf16.mxu1 %v3008_v0 }
  0x6c   : > { %2655 = vmatprep.mubr.msk.bf16.mxu0 %vm3009_vm0, %v3008_v0  ;;  %2673 = vmatprep.mubr.msk.bf16.mxu1 %vm3009_vm0, %v3008_v0 }
  0x72   : > { %2644 = vmatpush3.bf16.xpose.msra.mxu0 %v890_v61  ;;  %2662 = vmatpush3.bf16.xpose.msra.mxu1 %v992_v62  ;;  %v1082_v61 = vsel %vm482_vm1, %v2847_v59, 0  ;;  %v1184_v62 = vsel %vm482_vm1, %v2848_v60, 0 }
  0x73   : > { %2645 = vmatprep.subr.bf16.mxu0 %v3008_v0  ;;  %2663 = vmatprep.subr.bf16.mxu1 %v3008_v0 }
  0x7a   : > { %2646 = vmatpush3.bf16.xpose.msra.mxu0 %v887_v2  ;;  %2664 = vmatpush3.bf16.xpose.msra.mxu1 %v989_v3  ;;  %v1079_v2 = vsel %vm482_vm1, %v2849_v63, 0  ;;  %v1181_v3 = vsel %vm482_vm1, %v2850_v1, 0 }
  0x7b   : > { %2647 = vmatprep.subr.bf16.mxu0 %v3008_v0  ;;  %2665 = vmatprep.subr.bf16.mxu1 %v3008_v0 }
  0x82   : > { %2648 = vmatpush3.bf16.xpose.msra.mxu0 %v884_v6  ;;  %2666 = vmatpush3.bf16.xpose.msra.mxu1 %v986_v7  ;;  %v1301_v6 = vsel %vm482_vm1, %v2851_v4, 0  ;;  %v1403_v7 = vsel %vm482_vm1, %v2852_v5, 0 }
  0x83   : > { %2649 = vmatprep.subr.bf16.mxu0 %v3008_v0  ;;  %2667 = vmatprep.subr.bf16.mxu1 %v3008_v0 }
  0x8a   : > { %2650 = vmatpush3.bf16.xpose.msra.mxu0 %v881_v11  ;;  %2668 = vmatpush3.bf16.xpose.msra.mxu1 %v983_v12  ;;  %v1397_v12 = vsel %vm482_vm1, %v2856_v10, 0 }
  0x8b   : > { %2651 = vmatprep.subr.bf16.mxu0 %v3008_v0  ;;  %2669 = vmatprep.subr.bf16.mxu1 %v3008_v0 }
  0x92   : > { %2652 = vmatpush3.bf16.xpose.msra.mxu0 %v878_v22  ;;  %2670 = vmatpush3.bf16.xpose.msra.mxu1 %v980_v23  ;;  %v1289_v22 = vsel %vm482_vm1, %v2859_v18, 0  ;;  %v1391_v23 = vsel %vm482_vm1, %v2860_v19, 0 }
  0x93   : > { %2653 = vmatprep.subr.bf16.mxu0 %v3008_v0  ;;  %2671 = vmatprep.subr.bf16.mxu1 %v3008_v0 }
  0x9a   : > { %2654 = vmatpush3.bf16.xpose.msra.mxu0 %v875_v29  ;;  %2672 = vmatpush3.bf16.xpose.msra.mxu1 %v977_v30  ;;  %v1388_v29 = vsel %vm482_vm1, %v2862_v26, 0  ;;  %v2863_v30 = vld [vmem:[%s3146_s17 + $0x138] sm:$0xff]  }
  0x9b   : > { %2677 = vmatprep.subr.bf16.mxu0 %v3008_v0  ;;  %2695 = vmatprep.subr.bf16.mxu1 %v3008_v0  ;;  %v1283_v32 = vsel %vm482_vm1, %v2863_v30, 0 }
  0xa1   : > { %2656 = vmatmul.mubr.msk.bf16.vlgmr.msra.gmra.mxu0 %vm482_vm1, %v837_v35  ;;  %2674 = vmatmul.mubr.msk.bf16.vlgmr.msra.gmra.mxu1 %vm482_vm1, %v939_v36 }
  0xa2   : > { %2678 = vmatpush3.bf16.xpose.msra.mxu0 %v1097_v37  ;;  %2696 = vmatpush3.bf16.xpose.msra.mxu1 %v1199_v38 }
  0xa3   : > { %2679 = vmatprep.subr.bf16.mxu0 %v3008_v0  ;;  %2697 = vmatprep.subr.bf16.mxu1 %v3008_v0 }
  0xa4   : > { %2691 = vmatprep.mubr.msk.bf16.mxu0 %vm3009_vm0, %v3008_v0  ;;  %2709 = vmatprep.mubr.msk.bf16.mxu1 %vm3009_vm0, %v3008_v0 }
  0xaa   : > { %2680 = vmatpush3.bf16.xpose.msra.mxu0 %v1094_v42  ;;  %2698 = vmatpush3.bf16.xpose.msra.mxu1 %v1196_v43 }
  0xab   : > { %2681 = vmatprep.subr.bf16.mxu0 %v3008_v0  ;;  %2699 = vmatprep.subr.bf16.mxu1 %v3008_v0 }
  0xb2   : > { %2682 = vmatpush3.bf16.xpose.msra.mxu0 %v1091_v49  ;;  %2700 = vmatpush3.bf16.xpose.msra.mxu1 %v1193_v50 }
  0xb3   : > { %2683 = vmatprep.subr.bf16.mxu0 %v3008_v0  ;;  %2701 = vmatprep.subr.bf16.mxu1 %v3008_v0 }
  0xba   : > { %2684 = vmatpush3.bf16.xpose.msra.mxu0 %v1088_v53  ;;  %2702 = vmatpush3.bf16.xpose.msra.mxu1 %v1190_v54 }
  0xbb   : > { %2685 = vmatprep.subr.bf16.mxu0 %v3008_v0  ;;  %2703 = vmatprep.subr.bf16.mxu1 %v3008_v0 }
  0xc2   : > { %2686 = vmatpush3.bf16.xpose.msra.mxu0 %v1085_v57  ;;  %2704 = vmatpush3.bf16.xpose.msra.mxu1 %v1187_v58 }
  0xc3   : > { %2687 = vmatprep.subr.bf16.mxu0 %v3008_v0  ;;  %2705 = vmatprep.subr.bf16.mxu1 %v3008_v0 }
  0xca   : > { %2688 = vmatpush3.bf16.xpose.msra.mxu0 %v1082_v61  ;;  %2706 = vmatpush3.bf16.xpose.msra.mxu1 %v1184_v62  ;;  %v3433_v62 = vstv %s3414_s27  ;;  %s3640_s27 = sld [smem:[#allocation2 + $0x5]] }
  0xcb   : > { %2689 = vmatprep.subr.bf16.mxu0 %v3008_v0  ;;  %2707 = vmatprep.subr.bf16.mxu1 %v3008_v0 }
  0xd2   : > { %2690 = vmatpush3.bf16.xpose.msra.mxu0 %v1079_v2  ;;  %2708 = vmatpush3.bf16.xpose.msra.mxu1 %v1181_v3 }
  0xd3   : > { %2713 = vmatprep.subr.bf16.mxu0 %v3008_v0  ;;  %2731 = vmatprep.subr.bf16.mxu1 %v3008_v0 }
  0xd9   : > { %2692 = vmatmul.mubr.msk.bf16.vlgmr.msra.gmra.mxu0 %vm482_vm1, %v3209_v44  ;;  %2710 = vmatmul.mubr.msk.bf16.vlgmr.msra.gmra.mxu1 %vm482_vm1, %v1143_v47  ;;  %v1298_v44 = vsel %vm482_vm1, %v2853_v8, 0  ;;  %v2855_v47 = vld [vmem:[%s3146_s17 + $0x158] sm:$0xff]   ;;  %s3014_s17 = smov 126  }
  0xda   : > { %2714 = vmatpush3.bf16.xpose.msra.mxu0 %v1301_v6  ;;  %2732 = vmatpush3.bf16.xpose.msra.mxu1 %v1403_v7  ;;  %v1295_v11 = vsel %vm482_vm1, %v2855_v47, 0 }
  0xdb   : > { %2715 = vmatprep.subr.bf16.mxu0 %v3008_v0  ;;  %2733 = vmatprep.subr.bf16.mxu1 %v3008_v0 }
  0xdc   : > { %2727 = vmatprep.mubr.msk.bf16.mxu0 %vm3009_vm0, %v3008_v0  ;;  %2745 = vmatprep.mubr.msk.bf16.mxu1 %vm3009_vm0, %v3008_v0 }
  0xe2   : > { %2716 = vmatpush3.bf16.xpose.msra.mxu0 %v1298_v44  ;;  %2734 = vmatpush3.bf16.xpose.msra.mxu1 %v1400_v45 }
  0xe3   : > { %2717 = vmatprep.subr.bf16.mxu0 %v3008_v0  ;;  %2735 = vmatprep.subr.bf16.mxu1 %v3008_v0 }
  0xea   : > { %2718 = vmatpush3.bf16.xpose.msra.mxu0 %v1295_v11  ;;  %2736 = vmatpush3.bf16.xpose.msra.mxu1 %v1397_v12 }
  0xeb   : > { %2719 = vmatprep.subr.bf16.mxu0 %v3008_v0  ;;  %2737 = vmatprep.subr.bf16.mxu1 %v3008_v0 }
  0xf2   : > { %2720 = vmatpush3.bf16.xpose.msra.mxu0 %v1292_v16  ;;  %2738 = vmatpush3.bf16.xpose.msra.mxu1 %v1394_v17 }
  0xf3   : > { %2721 = vmatprep.subr.bf16.mxu0 %v3008_v0  ;;  %2739 = vmatprep.subr.bf16.mxu1 %v3008_v0 }
  0xfa   : > { %2722 = vmatpush3.bf16.xpose.msra.mxu0 %v1289_v22  ;;  %2740 = vmatpush3.bf16.xpose.msra.mxu1 %v1391_v23 }
  0xfb   : > { %2723 = vmatprep.subr.bf16.mxu0 %v3008_v0  ;;  %2741 = vmatprep.subr.bf16.mxu1 %v3008_v0 }
 0x102   : > { %2724 = vmatpush3.bf16.xpose.msra.mxu0 %v1286_v27  ;;  %2742 = vmatpush3.bf16.xpose.msra.mxu1 %v1388_v29 }
 0x103   : > { %2725 = vmatprep.subr.bf16.mxu0 %v3008_v0  ;;  %2743 = vmatprep.subr.bf16.mxu1 %v3008_v0 }
 0x10a   : > { %2726 = vmatpush3.bf16.xpose.msra.mxu0 %v1283_v32  ;;  %2744 = vmatpush3.bf16.xpose.msra.mxu1 %v1385_v33 }
 0x111   : > { %2728 = vmatmul.mubr.msk.bf16.vlgmr.msra.gmra.mxu0 %vm482_vm1, %v3266_v20  ;;  %2746 = vmatmul.mubr.msk.bf16.vlgmr.msra.gmra.mxu1 %vm482_vm1, %v1347_v24 }
 0x129   : > { %v3388_v34 = vpop.f32.mrf.mxu0  ;;  %v3390_v35 = vpop.f32.mrf.mxu1 }
 0x12a   : > { %4109 = vst [vmem:[#allocation10_spill] sm:$0xff] %v3388_v34  ;;  %4110 = vst [vmem:[#allocation11_spill] sm:$0xff] %v3390_v35  ;;  %1587 = vrot.lane.b32.xlu1 %v3388_v34, %s4074_s25  ;;  %1589 = vrot.lane.b32.xlu0 %v3390_v35, %s4074_s25  ;;  %v1456_v7 = vadd.f32 1.0, %v3390_v35  ;;  %v1455_v9 = vadd.f32 1.0, %v3388_v34 }
 0x12b   : > { %v2621_v0 = vpop.f32.mrf.mxu0  ;;  %v2639_v36 = vpop.f32.mrf.mxu1 }
 0x12d   : > { %v728_v37 = vpop.f32.mrf.mxu0  ;;  %v830_v20 = vpop.f32.mrf.mxu1 }
 0x12e   : > { %1932 = vrot.lane.b32.xlu0 %v3390_v35, %s3012_s26 }
 0x12f   : > { %v2622_v40 = vpop.f32.mrf.mxu0  ;;  %v2640_v21 = vpop.f32.mrf.mxu1 }
 0x132   : > { %1930 = vrot.lane.b32.xlu0 %v3388_v34, %s3012_s26 }
 0x161   : > { %v3400_v24 = vpop.f32.mrf.mxu0  ;;  %v3402_v38 = vpop.f32.mrf.mxu1 }
 0x162   : > { %1591 = vrot.lane.b32.xlu0 %v3400_v24, %s4074_s25  ;;  %1593 = vrot.lane.b32.xlu1 %v3402_v38, %s4074_s25  ;;  %v1457_v49 = vadd.f32 1.0, %v3400_v24  ;;  %v1458_v50 = vadd.f32 1.0, %v3402_v38 }
 0x163   : > { %v2657_v39 = vpop.f32.mrf.mxu0  ;;  %v2675_v41 = vpop.f32.mrf.mxu1 }
 0x164   : > { %2867 = vrcp.f32 %v1457_v49 }
 0x165   : > { %v932_v42 = vpop.f32.mrf.mxu0  ;;  %v1034_v43 = vpop.f32.mrf.mxu1  ;;  %2869 = vrcp.f32 %v1458_v50 }
 0x166   : > { %1934 = vrot.lane.b32.xlu1 %v3400_v24, %s3012_s26 }
 0x167   : > { %v2658_v46 = vpop.f32.mrf.mxu0  ;;  %v2676_v48 = vpop.f32.mrf.mxu1 }
 0x16a   : > { %1936 = vrot.lane.b32.xlu1 %v3402_v38, %s3012_s26 }
 0x171   : > { %v2868_v52 = vpop.eup %2867 }
 0x172   : > { %v3426_v58 = vmul.f32 %v2868_v52, %v3400_v24  ;;  %v2870_v59 = vpop.eup %2869 }
 0x173   : > { %v3438_v2 = vmul.f32 %v2870_v59, %v3402_v38 }
 0x174   : > { %v1541_v1 = vmul.f32 %v3433_v62, %v3426_v58 }
 0x175   : > { %v1542_v3 = vmul.f32 %v3433_v62, %v3438_v2 }
 0x199   : > { %v3416_v51 = vpop.f32.mrf.mxu0  ;;  %v3418_v53 = vpop.f32.mrf.mxu1 }
 0x19a   : > { %1595 = vrot.lane.b32.xlu0 %v3416_v51, %s4074_s25  ;;  %v1460_v54 = vadd.f32 1.0, %v3418_v53  ;;  %1597 = vrot.lane.b32.xlu1 %v3418_v53, %s4074_s25  ;;  %v1459_v44 = vadd.f32 1.0, %v3416_v51 }
 0x19b   : > { %v2693_v55 = vpop.f32.mrf.mxu0  ;;  %v2711_v56 = vpop.f32.mrf.mxu1 }
 0x19c   : > { %2871 = vrcp.f32 %v1460_v54  ;;  %v1590_v8 = vpop.permute.xlu0 %1589  ;;  %v1588_v19 = vpop.permute.xlu1 %1587 }
 0x19d   : > { %v1136_v57 = vpop.f32.mrf.mxu0  ;;  %v1238_v60 = vpop.f32.mrf.mxu1  ;;  %2873 = vrcp.f32 %v1456_v7  ;;  %v3465_v15 = vmul.f32 %v1590_v8, %v3390_v35  ;;  %v3473_v27 = vmul.f32 %v1588_v19, %v3388_v34 }
 0x19e   : > { %1938 = vrot.lane.b32.xlu0 %v3416_v51, %s3012_s26  ;;  %1940 = vrot.lane.b32.xlu1 %v3418_v53, %s3012_s26  ;;  %2875 = vrcp.f32 %v1455_v9 }
 0x19f   : > { %v2694_v61 = vpop.f32.mrf.mxu0  ;;  %v2712_v63 = vpop.f32.mrf.mxu1  ;;  %2877 = vrcp.f32 %v1459_v44 }
 0x1a0   : > { %v1933_v45 = vpop.permute.xlu0 %1932  ;;  %v3535_v61 = vstv %s2533_s29  ;;  %s3664_s29 = sld [smem:[#allocation2 + $0x6]] }
 0x1a1   : > { %v3533_v60 = vmul.f32 %v1933_v45, %v3390_v35  ;;  %v1483_v7 = vmul.f32 %v3535_v61, %v3438_v2 }
 0x1a2   : > { %1559 = vrot.lane.b32.xlu1 %v1541_v1, %s3013_s28 }
 0x1a4   : > { %v3455_v10 = vpop.permute.xlu0 %1930 }
 0x1a6   : > { %1561 = vrot.lane.b32.xlu1 %v1542_v3, %s3013_s28 }
 0x1a9   : > { %v2872_v4 = vpop.eup %2871 }
 0x1aa   : > { %v3445_v5 = vmul.f32 %v2872_v4, %v3418_v53  ;;  %v2874_v18 = vpop.eup %2873  ;;  %v3547_v4 = vstv %s1831_s16  ;;  %s439_s16 = scalar_lea.vmem %s4067_s3, %s3150_s21 }
 0x1ab   : > { %v3476_v29 = vmul.f32 %v2874_v18, %v3390_v35  ;;  %v2876_v31 = vpop.eup %2875  ;;  %4111 = vst [vmem:[#allocation12_spill] sm:$0xff] %v3547_v4 }
 0x1ac   : > { %v1544_v6 = vmul.f32 %v3433_v62, %v3445_v5  ;;  %v3488_v36 = vmul.f32 %v2876_v31, %v3388_v34  ;;  %v2878_v37 = vpop.eup %2877 }
 0x1ad   : > { %v1540_v0 = vmul.f32 %v3433_v62, %v3476_v29  ;;  %v3499_v21 = vmul.f32 %v2878_v37, %v3416_v51 }
 0x1ae   : > { %1565 = vrot.lane.b32.xlu1 %v1544_v6, %s3013_s28  ;;  %v1539_v40 = vmul.f32 %v3433_v62, %v3488_v36 }
 0x1af   : > { %v1543_v42 = vmul.f32 %v3433_v62, %v3499_v21 }
 0x1d1   : > { %v3453_v47 = vpop.f32.mrf.mxu0  ;;  %v3457_v11 = vpop.f32.mrf.mxu1 }
 0x1d2   : > { %1599 = vrot.lane.b32.xlu0 %v3453_v47, %s4074_s25  ;;  %v1462_v12 = vadd.f32 1.0, %v3457_v11  ;;  %1601 = vrot.lane.b32.xlu1 %v3457_v11, %s4074_s25  ;;  %v1461_v16 = vadd.f32 1.0, %v3453_v47 }
 0x1d3   : > { %v2729_v14 = vpop.f32.mrf.mxu0  ;;  %v2747_v17 = vpop.f32.mrf.mxu1 }
 0x1d4   : > { %2879 = vrcp.f32 %v1462_v12  ;;  %v1592_v23 = vpop.permute.xlu0 %1591  ;;  %v1594_v33 = vpop.permute.xlu1 %1593 }
 0x1d5   : > { %v1340_v22 = vpop.f32.mrf.mxu0  ;;  %v1442_v25 = vpop.f32.mrf.mxu1  ;;  %2881 = vrcp.f32 %v1461_v16  ;;  %v3479_v32 = vmul.f32 %v1592_v23, %v3400_v24  ;;  %v3491_v20 = vmul.f32 %v1594_v33, %v3402_v38  ;;  %v3615_v33 = vld [vmem:[%s3160_s24] sm:$0xff]  ;;  %s3634_s24 = sld [smem:[#allocation2 + $0x3]] }
 0x1d6   : > { %1637 = vrot.lane.b32.xlu0 %v3465_v15, %s3013_s28  ;;  %1944 = vrot.lane.b32.xlu1 %v3457_v11, %s3012_s26  ;;  %2883 = vlog2.f32 %v3171_v13 }
 0x1d7   : > { %v2730_v26 = vpop.f32.mrf.mxu0  ;;  %v2748_v30 = vpop.f32.mrf.mxu1 }
 0x1d8   : > { %v1935_v50 = vpop.permute.xlu1 %1934 }
 0x1d9   : > { %v3543_v1 = vmul.f32 %v1935_v50, %v3400_v24  ;;  %v3711_v50 = vmul.f32 4.0, %v3615_v33 }
 0x1da   : > { %1635 = vrot.lane.b32.xlu0 %v3473_v27, %s3013_s28  ;;  %1639 = vrot.lane.b32.xlu1 %v3479_v32, %s3013_s28 }
 0x1dc   : > { %v1937_v52 = vpop.permute.xlu1 %1936 }
 0x1dd   : > { %v3570_v12 = vmul.f32 %v1937_v52, %v3402_v38 }
 0x1de   : > { %1557 = vrot.lane.b32.xlu0 %v1540_v0, %s3013_s28  ;;  %1641 = vrot.lane.b32.xlu1 %v3491_v20, %s3013_s28  ;;  %v2059_v0 = vmul.f32 2.0, %v3615_v33 }
 0x1e1   : > { %v2880_v39 = vpop.eup %2879 }
 0x1e2   : > { %1555 = vrot.lane.b32.xlu0 %v1539_v40, %s3013_s28  ;;  %v3503_v41 = vmul.f32 %v2880_v39, %v3457_v11  ;;  %v2882_v43 = vpop.eup %2881  ;;  %v3621_v40 = vstv %s3528_s14  ;;  %s425_s14 = sand.u32 1, %s2997_s10  }
 0x1e3   : > { %v3512_v48 = vmul.f32 %v2882_v43, %v3453_v47  ;;  %s2448_s25 = sshll.u32 %s425_s14, 3  ;;  %s2259_s0 = scalar_lea.sflag [#allocation3], %s425_s14 }
 0x1e4   : > { %v1546_v46 = vmul.f32 %v3433_v62, %v3503_v41 }
 0x1e5   : > { %v1545_v49 = vmul.f32 %v3433_v62, %v3512_v48  ;;  %v1482_v62 = vmul.f32 %v3535_v61, %v3426_v58  ;;  %v3558_v58 = vmul.f32 %v3455_v10, %v3388_v34  ;;  %v1485_v10 = vmul.f32 %v3535_v61, %v3445_v5 }
 0x1e6   : > { %1563 = vrot.lane.b32.xlu0 %v1543_v42, %s3013_s28  ;;  %1569 = vrot.lane.b32.xlu1 %v1546_v46, %s3013_s28  ;;  %v3632_v42 = vmul.f32 %v2059_v0, %v3621_v40  ;;  %v1481_v46 = vmul.f32 %v3535_v61, %v3476_v29  ;;  %v1480_v29 = vmul.f32 %v3535_v61, %v3488_v36 }
 0x1ea   : > { %1942 = vrot.lane.b32.xlu0 %v3453_v47, %s3012_s26  ;;  %s3625_s26 = sld [smem:[#allocation2 + $0x4]] }
 0x1ee   : > { %1567 = vrot.lane.b32.xlu0 %v1545_v49, %s3013_s28 }
 0x1f0   : > { %v1667_v36 = vstv %s3625_s26  ;;  %s435_s26 = scalar_lea.vmem %s4122_s2, %s3150_s21 }
 0x20c   : > { %v1596_v54 = vpop.permute.xlu0 %1595  ;;  %v1598_v56 = vpop.permute.xlu1 %1597 }
 0x20d   : > { %v3520_v55 = vmul.f32 %v1596_v54, %v3416_v51  ;;  %v3523_v57 = vmul.f32 %v1598_v56, %v3418_v53  ;;  %v2884_v56 = vpop.eup %2883 }
 0x20f   : > { %1643 = vrot.lane.b32.xlu0 %v3520_v55, %s3013_s28  ;;  %1645 = vrot.lane.b32.xlu1 %v3523_v57, %s3013_s28 }
 0x210   : > { %v1941_v59 = vpop.permute.xlu1 %1940  ;;  %v1939_v17 = vpop.permute.xlu0 %1938 }
 0x211   : > { %v3586_v19 = vmul.f32 %v1939_v17, %v3416_v51  ;;  %v3595_v5 = vmul.f32 %v1941_v59, %v3418_v53  ;;  %v1671_v59 = vstv %s3640_s27 }
 0x213   : > { %1980 = vrot.lane.b32.xlu1 %v3533_v60, %s3014_s17  ;;  %4115 = vst [vmem:[#allocation16_spill] sm:$0xff] %v3586_v19  ;;  %4116 = vst [vmem:[#allocation17_spill] sm:$0xff] %v3595_v5 }
 0x214   : > { %v1560_v63 = vpop.permute.xlu1 %1559 }
 0x215   : > { %v3545_v3 = vadd.f32 %v1560_v63, %v1482_v62  ;;  %v3656_v62 = vstv %s3623_s23  ;;  %v1669_v63 = vstv %s3634_s24  ;;  %s3885_s24 = sld [smem:[#allocation2]] }
 0x217   : > { %v3550_v6 = vmul.f32 4.0, %v3545_v3  ;;  %1982 = vrot.lane.b32.xlu1 %v3543_v1, %s3014_s17  ;;  %v2096_v22 = vrot.slane %v3545_v3, 6 }
 0x218   : > { %v1562_v8 = vpop.permute.xlu1 %1561 }
 0x219   : > { %4112 = vst [vmem:[#allocation13_spill] sm:$0xff] %v3550_v6  ;;  %v3562_v44 = vadd.f32 %v1562_v8, %v1483_v7  ;;  %v1484_v7 = vmul.f32 %v3535_v61, %v3499_v21 }
 0x21b   : > { %v3565_v45 = vmul.f32 4.0, %v3562_v44  ;;  %1978 = vrot.lane.b32.xlu1 %v3558_v58, %s3014_s17  ;;  %v2098_v2 = vrot.slane %v3562_v44, 5 }
 0x21d   : > { %4113 = vst [vmem:[#allocation14_spill] sm:$0xff] %v3565_v45 }
 0x21f   : > { %1984 = vrot.lane.b32.xlu1 %v3570_v12, %s3014_s17 }
 0x220   : > { %v1566_v14 = vpop.permute.xlu1 %1565 }
 0x221   : > { %v3578_v16 = vadd.f32 %v1566_v14, %v1485_v10  ;;  %v474_v10 = vld [vmem:[%s439_s16] sm:$0xff]  ;;  %s451_s16 = scalar_lea.vmem %s4070_s6, %s3150_s21 }
 0x222   : > { %v1668_v9 = vmul.f32 %v1667_v36, %v474_v10  ;;  %v1486_v36 = vmul.f32 %v3535_v61, %v3512_v48 }
 0x223   : > { %v3581_v18 = vmul.f32 4.0, %v3578_v16  ;;  %2012 = vrot.lane.b32.xlu1 %v3533_v60, %s4076_s22  ;;  %v2047_v45 = vmul.f32 2.0, %v3578_v16  ;;  %v2102_v6 = vrot.slane %v3578_v16, 3 }
 0x225   : > { %4114 = vst [vmem:[#allocation15_spill] sm:$0xff] %v3581_v18  ;;  %v2045_v18 = vmul.f32 2.0, %v3562_v44 }
 0x227   : > { %1986 = vrot.lane.b32.xlu1 %v3586_v19, %s3014_s17 }
 0x22b   : > { %2014 = vrot.lane.b32.xlu1 %v3543_v1, %s4076_s22 }
 0x22f   : > { %1988 = vrot.lane.b32.xlu1 %v3595_v5, %s3014_s17 }
 0x233   : > { %2016 = vrot.lane.b32.xlu1 %v3570_v12, %s4076_s22 }
 0x244   : > { %v1600_v23 = vpop.permute.xlu0 %1599  ;;  %v1602_v26 = vpop.permute.xlu1 %1601 }
 0x245   : > { %v3602_v25 = vmul.f32 %v1600_v23, %v3453_v47  ;;  %v3606_v30 = vmul.f32 %v1602_v26, %v3457_v11 }
 0x247   : > { %1647 = vrot.lane.b32.xlu0 %v3602_v25, %s3013_s28  ;;  %1649 = vrot.lane.b32.xlu1 %v3606_v30, %s3013_s28 }
 0x248   : > { %v3612_v31 = vpop.permute.xlu0 %1637  ;;  %v3618_v37 = vpop.permute.xlu1 %1944 }
 0x24b   : > { %2018 = vrot.lane.b32.xlu1 %v3586_v19, %s4076_s22 }
 0x24c   : > { %v3629_v39 = vpop.permute.xlu0 %1635  ;;  %v3636_v43 = vpop.permute.xlu1 %1639 }
 0x24f   : > { %2020 = vrot.lane.b32.xlu1 %v3595_v5, %s4076_s22  ;;  %s443_s22 = scalar_lea.vmem %s4068_s4, %s3150_s21 }
 0x250   : > { %v1558_v49 = vpop.permute.xlu0 %1557  ;;  %v3678_v0 = vpop.permute.xlu1 %1641  ;;  %v475_v23 = vld [vmem:[%s443_s22] sm:$0xff]  ;;  %s447_s22 = scalar_lea.vmem %s4069_s5, %s3150_s21 }
 0x251   : > { %v3650_v54 = vadd.f32 %v1558_v49, %v1481_v46  ;;  %v3680_v49 = vmul.f32 0.6931472, %v2884_v56  ;;  %v1487_v56 = vmul.f32 %v3535_v61, %v3503_v41  ;;  %v1670_v61 = vadd.f32 %v1669_v63, %v1668_v9 }
 0x252   : > { %v1672_v10 = vmul.f32 %v1671_v59, %v475_v23  ;;  %v3726_v59 = vld [vmem:[%s451_s16] sm:$0xff]  ;;  %s3016_s16 = smov 32  }
 0x253   : > { %v3662_v8 = vmul.f32 4.0, %v3650_v54  ;;  %1508 = vrot.lane.b32.xlu1 %v3390_v35, %s3013_s28  ;;  %v2094_v26 = vrot.slane %v3650_v54, 7  ;;  %4118 = vst [vmem:[#allocation19_spill] sm:$0xff] %v3680_v49  ;;  %v483_v41 = vsel %vm482_vm1, %v3680_v49, 0.0  ;;  %v2190_v63 = vrot.slane %v3726_v59, 1 }
 0x254   : > { %v1556_v14 = vpop.permute.xlu0 %1555 }
 0x255   : > { %4117 = vst [vmem:[#allocation18_spill] sm:$0xff] %v3662_v8  ;;  %v1579_v46 = vadd.f32 %v1556_v14, %v1480_v29 }
 0x257   : > { %v3684_v21 = vmul.f32 4.0, %v1579_v46  ;;  %v2095_v17 = vsel %vm1908_vm2, %v2094_v26, %v1579_v46  ;;  %1506 = vrot.lane.b32.xlu1 %v3388_v34, %s3013_s28  ;;  %v2042_v35 = vmul.f32 2.0, %v1579_v46  ;;  %v2054_v46 = vsub.f32 %v3621_v40, %v2045_v18 }
 0x258   : > { %v2097_v52 = vsel %vm1911_vm3, %v2096_v22, %v2095_v17  ;;  %v1564_v29 = vpop.permute.xlu0 %1563  ;;  %v1570_v26 = vpop.permute.xlu1 %1569  ;;  %v2044_v22 = vmul.f32 2.0, %v3545_v3  ;;  %v2043_v3 = vmul.f32 2.0, %v3650_v54  ;;  %v3740_v54 = vld [vmem:[%s435_s26] sm:$0xff]  ;;  %s2538_s26 = sshll.u32 %s3089_s13, 7  ;;  %s3017_s13 = smov [#allocation5]  }
 0x259   : > { %4119 = vst [vmem:[#allocation20_spill] sm:$0xff] %v3684_v21  ;;  %v2099_v14 = vsel %vm1914_vm4, %v2098_v2, %v2097_v52  ;;  %v1583_v17 = vadd.f32 %v1564_v29, %v1484_v7  ;;  %v1586_v48 = vadd.f32 %v1570_v26, %v1487_v56  ;;  %v476_v7 = vld [vmem:[%s447_s22] sm:$0xff]  ;;  %v1674_v29 = vstv %s3664_s29  ;;  %s4135_s29 = smov 96   ;;  %s3879_s22 = sld [smem:[#allocation2 + $0x7]] }
 0x25a   : > { %v1673_v26 = vadd.f32 %v1672_v10, %v1670_v61  ;;  %v1675_v8 = vmul.f32 %v1674_v29, %v476_v7  ;;  %v1770_v16 = vmul.f32 4.0, %v3740_v54  ;;  %v2192_v10 = vrot.slane %v3726_v59, 3 }
 0x25b   : > { %v3714_v2 = vmul.f32 4.0, %v1583_v17  ;;  %v2100_v52 = vrot.slane %v1583_v17, 4  ;;  %v3720_v56 = vmul.f32 4.0, %v1586_v48  ;;  %v3750_v61 = vmul.f32 %v3618_v37, %v3457_v11 }
 0x25c   : > { %v1943_v9 = vpop.permute.xlu0 %1942  ;;  %v2056_v29 = vsub.f32 %v3621_v40, %v2047_v45  ;;  %v2051_v34 = vsub.f32 %v3621_v40, %v2042_v35 }
 0x25d   : > { %4120 = vst [vmem:[#allocation21_spill] sm:$0xff] %v3714_v2  ;;  %4121 = vst [vmem:[#allocation22_spill] sm:$0xff] %v3720_v56  ;;  %v2101_v44 = vsel %vm1917_vm5, %v2100_v52, %v2099_v14  ;;  %v3733_v23 = vmul.f32 %v1943_v9, %v3453_v47  ;;  %v2191_v14 = vrot.slane %v3726_v59, 2  ;;  %v2046_v52 = vmul.f32 2.0, %v1583_v17 }
 0x25e   : > { %v2103_v21 = vsel %vm1920_vm6, %v2102_v6, %v2101_v44  ;;  %v2049_v9 = vmul.f32 2.0, %v1586_v48  ;;  %v2053_v6 = vsub.f32 %v3621_v40, %v2044_v22  ;;  %v2052_v44 = vsub.f32 %v3621_v40, %v2043_v3 }
 0x25f   : > { %4123 = vst [vmem:[#allocation23_spill] sm:$0xff] %v3733_v23  ;;  %1990 = vrot.lane.b32.xlu1 %v3733_v23, %s3014_s17  ;;  %v3754_v17 = vadd.f32 %v1675_v8, %v1673_v26  ;;  %v2535_v56 = vadd.f32 -2.0, %v1770_v16  ;;  %v2055_v18 = vsub.f32 %v3621_v40, %v2046_v52  ;;  %v2193_v3 = vrot.slane %v3726_v59, 4 }
 0x260   : > { %v1568_v2 = vpop.permute.xlu0 %1567  ;;  %v2058_v37 = vsub.f32 %v3621_v40, %v2049_v9  ;;  %v4127_v16 = vrot.slane %v3632_v42, 2  ;;  %v4128_v9 = vrot.slane %v3632_v42, 3  ;;  %v4129_v8 = vrot.slane %v3632_v42, 5 }
 0x261   : > { %v1585_v7 = vadd.f32 %v1568_v2, %v1486_v36  ;;  %4124 = vst [vmem:[#allocation24_spill] sm:$0xff] %v3754_v17  ;;  %v2106_v36 = vrot.slane %v1586_v48, 1  ;;  %v3764_v45 = vmul.f32 %v2535_v56, %v3754_v17  ;;  %v2194_v48 = vrot.slane %v3726_v59, 5 }
 0x262   : > { %v2079_v26 = vsub.f32 %v2053_v6, %v4127_v16  ;;  %v2195_v56 = vrot.slane %v3726_v59, 6  ;;  %v2077_v6 = vsub.f32 %v2051_v34, %v3632_v42 }
 0x263   : > { %v3757_v5 = vmul.f32 4.0, %v1585_v7  ;;  %v2048_v19 = vmul.f32 2.0, %v1585_v7  ;;  %v2104_v22 = vrot.slane %v1585_v7, 2  ;;  %1992 = vrot.lane.b32.xlu1 %v3750_v61, %s3014_s17  ;;  %4126 = vst [vmem:[#allocation26_spill] sm:$0xff] %v3764_v45  ;;  %v2080_v7 = vsub.f32 %v2054_v46, %v4128_v9  ;;  %s4131_s17 = smov 124  }
 0x264   : > { %v4134_v46 = vrot.slane %v3632_v42, 6 }
 0x265   : > { %4125 = vst [vmem:[#allocation25_spill] sm:$0xff] %v3757_v5  ;;  %v2057_v35 = vsub.f32 %v3621_v40, %v2048_v19  ;;  %v2105_v2 = vsel %vm1923_vm7, %v2104_v22, %v2103_v21  ;;  %v2082_v19 = vsub.f32 %v2056_v29, %v4129_v8  ;;  %v4130_v40 = vrot.slane %v3632_v42, 1 }
 0x266   : > { %484 = vadd.xlane.f32.xlu0 %v483_v41  ;;  %v2107_v52 = vsel %vm1926_vm8, %v2106_v36, %v2105_v2  ;;  %v4132_v22 = vrot.slane %v3632_v42, 4  ;;  %v4133_v2 = vrot.slane %v3632_v42, 7 }
 0x267   : > { %v2078_v21 = vsub.f32 %v2052_v44, %v4130_v40  ;;  %2022 = vrot.lane.b32.xlu1 %v3733_v23, %s4131_s17  ;;  %v2109_v41 = vmul.f32 %v2107_v52, %v3711_v50  ;;  %v2083_v9 = vsub.f32 %v2057_v35, %v4134_v46  ;;  %v2196_v46 = vrot.slane %v3726_v59, 7 }
 0x268   : > { %v2081_v36 = vsub.f32 %v2055_v18, %v4132_v22  ;;  %v2084_v16 = vsub.f32 %v2058_v37, %v4133_v2  ;;  %v1660_v37 = vadd.f32 %v3612_v31, %v3465_v15 }
 0x269   : > { %v2111_v29 = vrot.slane %v2109_v41, 1  ;;  %v2112_v8 = vrot.slane %v2109_v41, 2  ;;  %v2113_v5 = vrot.slane %v2109_v41, 3  ;;  %v2114_v44 = vrot.slane %v2109_v41, 4 }
 0x26a   : > { %v2115_v40 = vrot.slane %v2109_v41, 5  ;;  %v2116_v4 = vrot.slane %v2109_v41, 6  ;;  %v2117_v45 = vrot.slane %v2109_v41, 7  ;;  %v2126_v23 = vadd.f32 %v2109_v41, %v2077_v6 }
 0x26b   : > { %1514 = vrot.lane.b32.xlu1 %v3416_v51, %s3013_s28  ;;  %v2127_v34 = vadd.f32 %v2111_v29, %v2078_v21  ;;  %v2128_v52 = vadd.f32 %v2112_v8, %v2079_v26  ;;  %v2129_v18 = vadd.f32 %v2113_v5, %v2080_v7  ;;  %v2130_v22 = vadd.f32 %v2114_v44, %v2081_v36 }
 0x26c   : > { %v2131_v42 = vadd.f32 %v2115_v40, %v2082_v19  ;;  %v2132_v35 = vadd.f32 %v2116_v4, %v2083_v9  ;;  %v2133_v2 = vadd.f32 %v2117_v45, %v2084_v16  ;;  %v2205_v21 = vmul.f32 %v2126_v23, %v3726_v59 }
 0x26d   : > { %v2206_v28 = vmul.f32 %v2190_v63, %v2127_v34  ;;  %v2207_v49 = vmul.f32 %v2191_v14, %v2128_v52  ;;  %v2208_v13 = vmul.f32 %v2192_v10, %v2129_v18  ;;  %v2209_v17 = vmul.f32 %v2193_v3, %v2130_v22 }
 0x26e   : > { %v2210_v26 = vmul.f32 %v2194_v48, %v2131_v42  ;;  %v1699_v41 = vmul.f32 %v3656_v62, %v1660_v37  ;;  %v2211_v15 = vmul.f32 %v2195_v56, %v2132_v35  ;;  %v1659_v4 = vadd.f32 %v3629_v39, %v3473_v27 }
 0x26f   : > { %1518 = vrot.lane.b32.xlu1 %v3453_v47, %s3013_s28  ;;  %v2221_v5 = vrot.slane %v2206_v28, 7  ;;  %v2223_v7 = vrot.slane %v2207_v49, 6  ;;  %v2212_v31 = vmul.f32 %v2196_v46, %v2133_v2  ;;  %v2225_v14 = vrot.slane %v2208_v13, 5 }
 0x270   : > { %v2227_v45 = vrot.slane %v2209_v17, 4  ;;  %v2229_v3 = vrot.slane %v2210_v26, 3  ;;  %v2231_v49 = vrot.slane %v2211_v15, 2  ;;  %v1698_v48 = vmul.f32 %v3656_v62, %v1659_v4 }
 0x271   : > { %v2222_v63 = vsel %vm1908_vm2, %v2221_v5, %v2205_v21  ;;  %v2233_v27 = vrot.slane %v2212_v31, 1  ;;  %v1661_v29 = vadd.f32 %v3636_v43, %v3479_v32  ;;  %v1662_v44 = vadd.f32 %v3678_v0, %v3491_v20 }
 0x272   : > { %v2224_v10 = vsel %vm1911_vm3, %v2223_v7, %v2222_v63  ;;  %v2178_v4 = vmul.f32 %v3711_v50, %v3740_v54 }
 0x273   : > { %1716 = vrot.lane.b32.xlu1 %v1699_v41, %s4135_s29  ;;  %v2226_v23 = vsel %vm1914_vm4, %v2225_v14, %v2224_v10  ;;  %v1700_v8 = vmul.f32 %v3656_v62, %v1661_v29  ;;  %v1701_v52 = vmul.f32 %v3656_v62, %v1662_v44  ;;  %v4140_v44 = vld [vmem:[#allocation16_spill] sm:$0xff] }
 0x274   : > { %v2228_v28 = vsel %vm1917_vm5, %v2227_v45, %v2226_v23  ;;  %v4136_v23 = vld [vmem:[#allocation24_spill] sm:$0xff] }
 0x275   : > { %v2230_v56 = vsel %vm1920_vm6, %v2229_v3, %v2228_v28 }
 0x276   : > { %v2232_v39 = vsel %vm1923_vm7, %v2231_v49, %v2230_v56 }
 0x277   : > { %1714 = vrot.lane.b32.xlu1 %v1698_v48, %s4135_s29  ;;  %v3813_v13 = vsel %vm1926_vm8, %v2233_v27, %v2232_v39  ;;  %v4137_v27 = vld [vmem:[#allocation8_spill] sm:$0xff]  ;;  %v4138_v39 = vld [vmem:[#allocation19_spill] sm:$0xff] }
 0x278   : > { %v2244_v50 = vmul.f32 %v4138_v39, %v4137_v27 }
 0x27c   : > { %2010 = vrot.lane.b32.xlu0 %v3558_v58, %s4131_s17 }
 0x280   : > { %1510 = vrot.lane.b32.xlu0 %v3400_v24, %s3013_s28 }
 0x281   : > { %v1644_v17 = vpop.permute.xlu0 %1643  ;;  %v1646_v6 = vpop.permute.xlu1 %1645 }
 0x282   : > { %v1663_v19 = vadd.f32 %v1644_v17, %v3520_v55  ;;  %v1664_v18 = vadd.f32 %v1646_v6, %v3523_v57  ;;  %v4139_v6 = vld [vmem:[#allocation9_spill] sm:$0xff] }
 0x284   : > { %v1702_v36 = vmul.f32 %v3656_v62, %v1663_v19  ;;  %2024 = vrot.lane.b32.xlu0 %v3750_v61, %s4131_s17  ;;  %v1703_v22 = vmul.f32 %v3656_v62, %v1664_v18  ;;  %v4141_v18 = vld [vmem:[#allocation17_spill] sm:$0xff]  ;;  %s427_s17 = scalar_lea.vmem [#allocation5], %s2448_s25  ;;  %s2945_s25 = sshll.u32 %s3017_s13, 4  ;;  %s2946_s25 = int_to_ptr.vmem [resolvable:$false] %s2945_s25 }
 0x285   : > { %v1981_v16 = vpop.permute.xlu1 %1980  ;;  %s2947_s2 = scalar_lea.vmem %s2946_s25, 256 }
 0x286   : > { %1722 = vrot.lane.b32.xlu1 %v1702_v36, %s4135_s29  ;;  %v2003_v34 = vadd.f32 %v1981_v16, %v3533_v60  ;;  %v2134_v36 = vsel %vm482_vm1, %v4139_v6, 0.0 }
 0x288   : > { %1512 = vrot.lane.b32.xlu0 %v3402_v38, %s3013_s28 }
 0x289   : > { %v1983_v9 = vpop.permute.xlu1 %1982 }
 0x28a   : > { %v2004_v20 = vadd.f32 %v1983_v9, %v3543_v1  ;;  %v2240_v1 = vadd.f32 1e-16, %v3615_v33  ;;  %v2236_v9 = vsel %vm482_vm1, %v3813_v13, 0.0 }
 0x28c   : > { %1516 = vrot.lane.b32.xlu0 %v3418_v53, %s3013_s28  ;;  %2885 = vlog2.f32 %v2240_v1 }
 0x28d   : > { %v3830_v55 = vpop.permute.xlu1 %1978 }
 0x290   : > { %1520 = vrot.lane.b32.xlu0 %v3457_v11, %s3013_s28  ;;  %s3870_s28 = sld [smem:[#allocation2 + $0x1]] }
 0x291   : > { %v1985_v40 = vpop.permute.xlu1 %1984 }
 0x292   : > { %v2005_v60 = vadd.f32 %v1985_v40, %v3570_v12 }
 0x294   : > { %1718 = vrot.lane.b32.xlu0 %v1700_v8, %s4135_s29 }
 0x295   : > { %v2013_v32 = vpop.permute.xlu1 %2012 }
 0x296   : > { %v2035_v43 = vadd.f32 %v2013_v32, %v2003_v34  ;;  %s1678_s27 = ssub.f32 %s3623_s23, %s3870_s28 }
 0x297   : > { %s1677_s23 = ssub.f32 %s3870_s28, %s3885_s24 }
 0x298   : > { %1720 = vrot.lane.b32.xlu0 %v1701_v52, %s4135_s29 }
 0x299   : > { %v1987_v37 = vpop.permute.xlu1 %1986  ;;  %v2886_v10 = vpop.eup %2885 }
 0x29a   : > { %v2242_v28 = vmul.f32 0.6931472, %v2886_v10  ;;  %v2006_v40 = vadd.f32 %v1987_v37, %v4140_v44  ;;  %v1849_v10 = vstv %s3879_s22 }
 0x29c   : > { %1724 = vrot.lane.b32.xlu0 %v1703_v22, %s4135_s29  ;;  %v2243_v56 = vmul.f32 %v3615_v33, %v2242_v28 }
 0x29d   : > { %v2015_v0 = vpop.permute.xlu1 %2014 }
 0x29e   : > { %v2036_v42 = vadd.f32 %v2015_v0, %v2004_v20  ;;  %v2002_v20 = vadd.f32 %v3830_v55, %v3558_v58  ;;  %v2142_v0 = vmul.f32 %v2035_v43, %v3656_v62 }
 0x2a0   : > { %v2157_v43 = vrot.slane %v2142_v0, 7 }
 0x2a1   : > { %v1989_v35 = vpop.permute.xlu1 %1988 }
 0x2a2   : > { %v2007_v32 = vadd.f32 %v1989_v35, %v4141_v18 }
 0x2a5   : > { %v2017_v2 = vpop.permute.xlu1 %2016 }
 0x2a6   : > { %v2037_v46 = vadd.f32 %v2017_v2, %v2005_v60  ;;  %v2143_v2 = vmul.f32 %v2036_v42, %v3656_v62 }
 0x2a8   : > { %v2159_v42 = vrot.slane %v2143_v2, 6 }
 0x2b9   : > { %v1648_v21 = vpop.permute.xlu0 %1647  ;;  %v1650_v26 = vpop.permute.xlu1 %1649 }
 0x2ba   : > { %v1665_v57 = vadd.f32 %v1648_v21, %v3602_v25  ;;  %v1666_v5 = vadd.f32 %v1650_v26, %v3606_v30  ;;  %v2180_v25 = vadd.f32 %v3615_v33, %v3740_v54  ;;  %v2179_v30 = vadd.f32 1.0, %v2178_v4 }
 0x2bb   : > { %v2245_v54 = vadd.f32 %v2244_v50, %v2243_v56  ;;  %v2144_v21 = vmul.f32 %v2037_v46, %v3656_v62  ;;  %v3904_v56 = vstv %s1678_s27 }
 0x2bc   : > { %v1704_v7 = vmul.f32 %v3656_v62, %v1665_v57  ;;  %v1705_v41 = vmul.f32 %v3656_v62, %v1666_v5  ;;  %v2181_v31 = vmul.f32 2.0, %v2180_v25  ;;  %v4142_v5 = vld [vmem:[#allocation23_spill] sm:$0xff] }
 0x2bd   : > { %v2019_v15 = vpop.permute.xlu1 %2018  ;;  %v2246_v16 = vmul.f32 %v2245_v54, %v3726_v59 }
 0x2be   : > { %1726 = vrot.lane.b32.xlu1 %v1704_v7, %s4135_s29  ;;  %1728 = vrot.lane.b32.xlu0 %v1705_v41, %s4135_s29  ;;  %v2182_v14 = vsub.f32 %v2179_v30, %v2181_v31  ;;  %v2038_v22 = vadd.f32 %v2019_v15, %v2006_v40  ;;  %v2161_v15 = vrot.slane %v2144_v21, 5  ;;  %v4143_v30 = vld [vmem:[#allocation10_spill] sm:$0xff]  ;;  %s2275_s29 = sshll.u32 %s427_s17, 4  ;;  %s2276_s29 = int_to_ptr.vmem [resolvable:$true] %s2275_s29 }
 0x2bf   : > { %v2247_v33 = vsel %vm482_vm1, %v2246_v16, 0.0  ;;  %v3918_v16 = vstv %s1677_s23  ;;  %s2941_s1 = scalar_lea.vmem %s2276_s29, 128  ;;  %p2948_p0 = scmp.lt.s32.totalorder %s2276_s29, %s2946_s25 }
 0x2c0   : > { %v2183_v3 = vmul.f32 %v2182_v14, %v4136_v23  ;;  %v2145_v26 = vmul.f32 %v2038_v22, %v3656_v62  ;;  %p2942_p9 = scmp.ne.s32.totalorder %s2276_s29, %s2941_s1  ;;  %p2949_p1 = scmp.lt.s32.totalorder %s2947_s2, %s2941_s1 }
 0x2c1   : > { %v2021_v12 = vpop.permute.xlu1 %2020 }
 0x2c2   : > { %v2184_v48 = vmul.f32 %v2183_v3, %v3726_v59  ;;  %v2039_v37 = vadd.f32 %v2021_v12, %v2007_v32  ;;  %v2163_v25 = vrot.slane %v2145_v26, 4  ;;  %v4144_v3 = vld [vmem:[#allocation11_spill] sm:$0xff]  ;;  %v4145_v32 = vld [vmem:[#allocation26_spill] sm:$0xff]  ;;  %p2943_p10 = pnand %p2942_p9, %p3106_p5  ;;  %p2950_p2 = por %p2949_p1, %p2948_p0 }
 0x2c4   : > { %v2185_v17 = vsel %vm482_vm1, %v2184_v48, 0.0  ;;  %v2146_v7 = vmul.f32 %v2039_v37, %v3656_v62  ;;  %p2944_p13 = pneg %p2943_p10 }
 0x2c5   : > { %v1509_v63 = vpop.permute.xlu1 %1508 }
 0x2c6   : > { %v2165_v23 = vrot.slane %v2146_v7, 3  ;;  %v1531_v28 = vadd.f32 %v1509_v63, %v4144_v3  ;;  %p2951_p3 = pnand %p2950_p2, %p2944_p13 }
 0x2c9   : > { %v1507_v45 = vpop.permute.xlu1 %1506 }
 0x2ca   : > { %v1530_v31 = vadd.f32 %v1507_v45, %v4143_v30  ;;  %v4146_v30 = vld [vmem:[#allocation21_spill] sm:$0xff] }
 0x2d1   : > { %v1991_v49 = vpop.permute.xlu1 %1990 }
 0x2d2   : > { %v2008_v58 = vadd.f32 %v1991_v49, %v4142_v5 }
 0x2d5   : > { %v1993_v19 = vpop.permute.xlu1 %1992 }
 0x2d6   : > { %v2009_v49 = vadd.f32 %v1993_v19, %v3750_v61  ;;  %v1680_v61 = vmul.f32 %v3904_v56, %v1530_v31  ;;  %v1681_v19 = vmul.f32 %v3904_v56, %v1531_v28  ;;  %v4147_v31 = vld [vmem:[#allocation12_spill] sm:$0xff] }
 0x2d8   : > { %v1689_v40 = vadd.f32 %v3918_v16, %v1680_v61  ;;  %v1690_v22 = vadd.f32 %v3918_v16, %v1681_v19 }
 0x2d9   : > { %v2023_v29 = vpop.permute.xlu1 %2022 }
 0x2da   : > { %v2040_v1 = vadd.f32 %v2023_v29, %v2008_v58 }
 0x2dd   : > { %2186 = vadd.xlane.f32.xlu0 %v2185_v17  ;;  %v1515_v8 = vpop.permute.xlu1 %1514  ;;  %v2536_v17 = vadd.f32 -1.0, %v3726_v59 }
 0x2de   : > { %v1534_v12 = vadd.f32 %v1515_v8, %v3416_v51  ;;  %v2147_v51 = vmul.f32 %v2040_v1, %v3656_v62 }
 0x2df   : > { %v3921_v8 = vmul.f32 100.0, %v2536_v17  ;;  %v4151_v17 = vld [vmem:[#allocation18_spill] sm:$0xff] }
 0x2e0   : > { %v1684_v50 = vmul.f32 %v3904_v56, %v1534_v12 }
 0x2e1   : > { %2237 = vadd.xlane.f32.xlu0 %v2236_v9  ;;  %v3872_v34 = vpop.permute.xlu1 %1518  ;;  %v1801_v61 = vrot.slane %v3921_v8, 2 }
 0x2e2   : > { %2135 = vadd.xlane.f32.xlu1 %v2134_v36  ;;  %v2167_v36 = vrot.slane %v2147_v51, 2 }
 0x2e5   : > { %2248 = vadd.xlane.f32.xlu0 %v2247_v33  ;;  %v3890_v55 = vpop.permute.xlu1 %1716  ;;  %v1693_v33 = vadd.f32 %v3918_v16, %v1684_v50 }
 0x2e6   : > { %v1739_v21 = vsub.f32 %v1690_v22, %v3890_v55 }
 0x2e9   : > { %v1715_v27 = vpop.permute.xlu1 %1714 }
 0x2ea   : > { %v1738_v2 = vsub.f32 %v1689_v40, %v1715_v27 }
 0x2ef   : > { %v3874_v52 = vpop.xlane.xlu0 %484 }
 0x2f0   : > { %v486_v13 = vsub.f32 %v3874_v52, %v4138_v39 }
 0x2f2   : > { %v487_v60 = vmul.f32 1.442695, %v486_v13  ;;  %v1777_v13 = vrot.slane %v4145_v32, 4 }
 0x2f3   : > { %v2011_v35 = vpop.permute.xlu0 %2010 }
 0x2f4   : > { %2887 = vpow2.f32 %v487_v60  ;;  %v2034_v57 = vadd.f32 %v2011_v35, %v2002_v20  ;;  %v1774_v60 = vrot.slane %v4145_v32, 1 }
 0x2f5   : > { %2889 = vrcp.f32 %v1849_v10 }
 0x2f6   : > { %v2141_v41 = vmul.f32 %v2034_v57, %v3656_v62 }
 0x2f7   : > { %v1511_v46 = vpop.permute.xlu0 %1510 }
 0x2f8   : > { %v2158_v4 = vsel %vm1908_vm2, %v2157_v43, %v2141_v41  ;;  %v1723_v9 = vpop.permute.xlu1 %1722  ;;  %v1532_v18 = vadd.f32 %v1511_v46, %v3400_v24  ;;  %v1803_v24 = vrot.slane %v3921_v8, 4 }
 0x2f9   : > { %v2160_v14 = vsel %vm1911_vm3, %v2159_v42, %v2158_v4  ;;  %v1742_v20 = vsub.f32 %v1693_v33, %v1723_v9  ;;  %v1800_v42 = vrot.slane %v3921_v8, 1 }
 0x2fa   : > { %v2162_v48 = vsel %vm1914_vm4, %v2161_v15, %v2160_v14  ;;  %v1682_v5 = vmul.f32 %v3904_v56, %v1532_v18  ;;  %v4148_v14 = vsub.f32 %v4146_v30, %v4147_v31 }
 0x2fb   : > { %v2025_v39 = vpop.permute.xlu0 %2024  ;;  %v2164_v45 = vsel %vm1917_vm5, %v2163_v25, %v2162_v48  ;;  %v4149_v48 = vld [vmem:[#allocation20_spill] sm:$0xff] }
 0x2fc   : > { %v2041_v54 = vadd.f32 %v2025_v39, %v2009_v49  ;;  %v2166_v63 = vsel %vm1920_vm6, %v2165_v23, %v2164_v45  ;;  %v1691_v12 = vadd.f32 %v3918_v16, %v1682_v5  ;;  %v4150_v51 = vsub.f32 %v4149_v48, %v4147_v31  ;;  %v4153_v5 = vld [vmem:[#allocation13_spill] sm:$0xff]  ;;  %v4157_v48 = vld [vmem:[#allocation15_spill] sm:$0xff] }
 0x2fd   : > { %v1775_v45 = vrot.slane %v4145_v32, 2 }
 0x2fe   : > { %v2148_v6 = vmul.f32 %v2041_v54, %v3656_v62  ;;  %v2168_v62 = vsel %vm1923_vm7, %v2167_v36, %v2166_v63  ;;  %v4152_v54 = vsub.f32 %v4151_v17, %v4147_v31 }
 0x2ff   : > { %v1513_v29 = vpop.permute.xlu0 %1512 }
 0x300   : > { %v2169_v59 = vrot.slane %v2148_v6, 1  ;;  %v1533_v7 = vadd.f32 %v1513_v29, %v3402_v38  ;;  %v1776_v29 = vrot.slane %v4145_v32, 3 }
 0x301   : > { %v3923_v44 = vpop.eup %2887 }
 0x302   : > { %v1750_v0 = vrot.slane %v3923_v44, 4  ;;  %v2170_v37 = vsel %vm1926_vm8, %v2169_v59, %v2168_v62  ;;  %v1747_v26 = vrot.slane %v3923_v44, 1  ;;  %v1762_v58 = vmul.f32 %v3923_v44, %v1738_v2  ;;  %v3945_v25 = vpop.eup %2889 }
 0x303   : > { %2171 = vrot.lane.b32.xlu1 %v2170_v37, %s3016_s16  ;;  %v1517_v35 = vpop.permute.xlu0 %1516  ;;  %v1683_v38 = vmul.f32 %v3904_v56, %v1533_v7  ;;  %v1748_v39 = vrot.slane %v3923_v44, 2  ;;  %s4018_s16 = scalar_lea.hbm %s4073_s9, %s2538_s26 }
 0x304   : > { %v1766_v57 = vmul.f32 %v1750_v0, %v1742_v20  ;;  %v1763_v41 = vmul.f32 %v1747_v26, %v1739_v21  ;;  %v1789_v46 = vadd.f32 %v4145_v32, %v1762_v58  ;;  %v1535_v3 = vadd.f32 %v1517_v35, %v3418_v53 }
 0x305   : > { %v1692_v36 = vadd.f32 %v3918_v16, %v1683_v38  ;;  %v1802_v20 = vrot.slane %v3921_v8, 3  ;;  %v1751_v21 = vrot.slane %v3923_v44, 5  ;;  %v4154_v58 = vsub.f32 %v4153_v5, %v4147_v31 }
 0x306   : > { %v1793_v43 = vadd.f32 %v1777_v13, %v1766_v57  ;;  %v1790_v15 = vadd.f32 %v1774_v60, %v1763_v41  ;;  %v1815_v4 = vadd.f32 %v3921_v8, %v1789_v46  ;;  %v1685_v53 = vmul.f32 %v3904_v56, %v1535_v3 }
 0x307   : > { %v3940_v1 = vpop.permute.xlu0 %1520  ;;  %v1749_v13 = vrot.slane %v3923_v44, 3  ;;  %v1804_v46 = vrot.slane %v3921_v8, 5  ;;  %v1806_v5 = vrot.slane %v3921_v8, 7 }
 0x308   : > { %v1819_v55 = vadd.f32 %v1803_v24, %v1793_v43  ;;  %v1816_v28 = vadd.f32 %v1800_v42, %v1790_v15  ;;  %v1841_v27 = vadd.f32 %v4150_v51, %v1815_v4  ;;  %v1694_v2 = vadd.f32 %v3918_v16, %v1685_v53  ;;  %v4155_v4 = vld [vmem:[#allocation14_spill] sm:$0xff] }
 0x309   : > { %v1778_v24 = vrot.slane %v4145_v32, 5  ;;  %v4156_v30 = vsub.f32 %v4155_v4, %v4147_v31  ;;  %v4158_v51 = vsub.f32 %v4157_v48, %v4147_v31 }
 0x30a   : > { %v1845_v23 = vadd.f32 %v4148_v14, %v1819_v55  ;;  %v1842_v63 = vadd.f32 %v4152_v54, %v1816_v28  ;;  %v1851_v19 = vmul.f32 %v3945_v25, %v1841_v27 }
 0x30b   : > { %v1719_v49 = vpop.permute.xlu0 %1718 }
 0x30c   : > { %v1740_v50 = vsub.f32 %v1691_v12, %v1719_v49  ;;  %v1852_v9 = vmul.f32 %v3945_v25, %v1842_v63  ;;  %v1855_v59 = vmul.f32 %v3945_v25, %v1845_v23  ;;  %v1859_v40 = vsub.f32 0.0, %v1851_v19 }
 0x30e   : > { %v1764_v6 = vmul.f32 %v1748_v39, %v1740_v50  ;;  %v1860_v22 = vsub.f32 0.0, %v1852_v9  ;;  %v1867_v0 = vmul.f32 1.442695, %v1859_v40  ;;  %v1863_v26 = vsub.f32 0.0, %v1855_v59 }
 0x30f   : > { %v1721_v33 = vpop.permute.xlu0 %1720  ;;  %v1537_v9 = vadd.f32 %v3940_v1, %v3457_v11  ;;  %v1779_v11 = vrot.slane %v4145_v32, 6 }
 0x310   : > { %v1791_v18 = vadd.f32 %v1775_v45, %v1764_v6  ;;  %v1741_v62 = vsub.f32 %v1692_v36, %v1721_v33  ;;  %v1869_v35 = vmul.f32 1.442695, %v1860_v22  ;;  %2891 = vpow2.f32 %v1867_v0 }
 0x311   : > { %v1875_v12 = vmul.f32 1.442695, %v1863_v26  ;;  %v1536_v6 = vadd.f32 %v3872_v34, %v3453_v47  ;;  %v1752_v0 = vrot.slane %v3923_v44, 6 }
 0x312   : > { %v1817_v37 = vadd.f32 %v1801_v61, %v1791_v18  ;;  %v1765_v60 = vmul.f32 %v1749_v13, %v1741_v62  ;;  %2893 = vpow2.f32 %v1869_v35  ;;  %v1687_v18 = vmul.f32 %v3904_v56, %v1537_v9 }
 0x313   : > { %v1725_v57 = vpop.permute.xlu0 %1724  ;;  %2895 = vpow2.f32 %v1875_v12  ;;  %v1686_v59 = vmul.f32 %v3904_v56, %v1536_v6  ;;  %v1753_v56 = vrot.slane %v3923_v44, 7  ;;  %v4161_v12 = vld [vmem:[#allocation22_spill] sm:$0xff] }
 0x314   : > { %v1843_v43 = vadd.f32 %v4154_v58, %v1817_v37  ;;  %v1792_v7 = vadd.f32 %v1776_v29, %v1765_v60  ;;  %v1743_v41 = vsub.f32 %v1694_v2, %v1725_v57  ;;  %v1696_v47 = vadd.f32 %v3918_v16, %v1687_v18 }
 0x315   : > { %v1695_v22 = vadd.f32 %v3918_v16, %v1686_v59  ;;  %v1780_v2 = vrot.slane %v4145_v32, 7  ;;  %v4162_v4 = vsub.f32 %v4161_v12, %v4147_v31 }
 0x316   : > { %v1818_v42 = vadd.f32 %v1802_v20, %v1792_v7  ;;  %v1767_v55 = vmul.f32 %v1751_v21, %v1743_v41  ;;  %v1853_v15 = vmul.f32 %v3945_v25, %v1843_v43 }
 0x318   : > { %v1844_v14 = vadd.f32 %v4156_v30, %v1818_v42  ;;  %v1794_v23 = vadd.f32 %v1778_v24, %v1767_v55  ;;  %v1861_v38 = vsub.f32 0.0, %v1853_v15  ;;  %v1805_v24 = vrot.slane %v3921_v8, 6  ;;  %v4159_v55 = vld [vmem:[#allocation25_spill] sm:$0xff] }
 0x319   : > { %v4160_v32 = vsub.f32 %v4159_v55, %v4147_v31 }
 0x31a   : > { %v1820_v3 = vadd.f32 %v1804_v46, %v1794_v23  ;;  %v1854_v28 = vmul.f32 %v3945_v25, %v1844_v14  ;;  %v1871_v49 = vmul.f32 1.442695, %v1861_v38 }
 0x31c   : > { %v1846_v27 = vadd.f32 %v4158_v51, %v1820_v3  ;;  %v1862_v39 = vsub.f32 0.0, %v1854_v28  ;;  %2897 = vpow2.f32 %v1871_v49 }
 0x31d   : > { %v2892_v17 = vpop.eup %2891 }
 0x31e   : > { %v1856_v45 = vmul.f32 %v3945_v25, %v1846_v27  ;;  %v1873_v50 = vmul.f32 1.442695, %v1862_v39  ;;  %v1883_v53 = vadd.f32 1.0, %v2892_v17 }
 0x31f   : > { %v2894_v63 = vpop.eup %2893 }
 0x320   : > { %v1864_v54 = vsub.f32 0.0, %v1856_v45  ;;  %2899 = vpow2.f32 %v1873_v50  ;;  %v1884_v19 = vadd.f32 1.0, %v2894_v63  ;;  %v2896_v36 = vpop.eup %2895 }
 0x321   : > { %v1887_v40 = vadd.f32 1.0, %v2896_v36 }
 0x322   : > { %v1877_v61 = vmul.f32 1.442695, %v1864_v54 }
 0x324   : > { %2901 = vpow2.f32 %v1877_v61 }
 0x325   : > { %2903 = vrcp.f32 %v1884_v19 }
 0x326   : > { %2905 = vrcp.f32 %v1883_v53 }
 0x329   : > { %v2898_v29 = vpop.eup %2897 }
 0x32a   : > { %v1885_v33 = vadd.f32 1.0, %v2898_v29 }
 0x32c   : > { %2907 = vrcp.f32 %v1885_v33 }
 0x32d   : > { %v2900_v13 = vpop.eup %2899  ;;  %2909 = vrcp.f32 %v1887_v40 }
 0x32e   : > { %v1886_v62 = vadd.f32 1.0, %v2900_v13 }
 0x330   : > { %v1727_v20 = vpop.permute.xlu1 %1726  ;;  %2911 = vrcp.f32 %v1886_v62  ;;  %v1729_v37 = vpop.permute.xlu0 %1728 }
 0x331   : > { %v2902_v34 = vpop.eup %2901  ;;  %v1744_v1 = vsub.f32 %v1695_v22, %v1727_v20  ;;  %v1745_v35 = vsub.f32 %v1696_v47, %v1729_v37 }
 0x332   : > { %v2904_v60 = vpop.eup %2903  ;;  %v1888_v21 = vadd.f32 1.0, %v2902_v34 }
 0x333   : > { %v1768_v57 = vmul.f32 %v1752_v0, %v1744_v1  ;;  %v1907_v26 = vrot.slane %v2904_v60, 7  ;;  %v2906_v16 = vpop.eup %2905  ;;  %v1769_v58 = vmul.f32 %v1753_v56, %v1745_v35 }
 0x334   : > { %2913 = vrcp.f32 %v1888_v21 }
 0x335   : > { %v1795_v43 = vadd.f32 %v1779_v11, %v1768_v57  ;;  %v1909_v7 = vsel %vm1908_vm2, %v1907_v26, %v2906_v16  ;;  %v1796_v41 = vadd.f32 %v1780_v2, %v1769_v58 }
 0x337   : > { %v1821_v42 = vadd.f32 %v1805_v24, %v1795_v43  ;;  %v1822_v46 = vadd.f32 %v1806_v5, %v1796_v41 }
 0x339   : > { %v2908_v44 = vpop.eup %2907  ;;  %v1847_v15 = vadd.f32 %v4160_v32, %v1821_v42  ;;  %v1848_v30 = vadd.f32 %v4162_v4, %v1822_v46 }
 0x33a   : > { %v1910_v14 = vrot.slane %v2908_v44, 6  ;;  %v2910_v23 = vpop.eup %2909 }
 0x33b   : > { %v1857_v8 = vmul.f32 %v3945_v25, %v1847_v15  ;;  %v1858_v38 = vmul.f32 %v3945_v25, %v1848_v30  ;;  %v1916_v39 = vrot.slane %v2910_v23, 4 }
 0x33c   : > { %v1912_v3 = vsel %vm1911_vm3, %v1910_v14, %v1909_v7 }
 0x33d   : > { %v2912_v28 = vpop.eup %2911  ;;  %v1865_v49 = vsub.f32 0.0, %v1857_v8  ;;  %v1866_v48 = vsub.f32 0.0, %v1858_v38 }
 0x33e   : > { %v1913_v51 = vrot.slane %v2912_v28, 5 }
 0x33f   : > { %v1879_v27 = vmul.f32 1.442695, %v1865_v49  ;;  %v1881_v45 = vmul.f32 1.442695, %v1866_v48 }
 0x340   : > { %v1915_v50 = vsel %vm1914_vm4, %v1913_v51, %v1912_v3 }
 0x341   : > { %v2914_v31 = vpop.eup %2913  ;;  %2915 = vpow2.f32 %v1879_v27  ;;  %v1918_v17 = vsel %vm1917_vm5, %v1916_v39, %v1915_v50 }
 0x342   : > { %2917 = vpow2.f32 %v1881_v45  ;;  %v1919_v54 = vrot.slane %v2914_v31, 3 }
 0x344   : > { %v1921_v25 = vsel %vm1920_vm6, %v1919_v54, %v1918_v17 }
 0x34e   : > { %v2916_v63 = vpop.eup %2915 }
 0x34f   : > { %v2918_v61 = vpop.eup %2917  ;;  %v1889_v19 = vadd.f32 1.0, %v2916_v63 }
 0x350   : > { %v1890_v53 = vadd.f32 1.0, %v2918_v61 }
 0x351   : > { %2919 = vrcp.f32 %v1889_v19 }
 0x352   : > { %2921 = vrcp.f32 %v1890_v53 }
 0x35e   : > { %v2920_v6 = vpop.eup %2919 }
 0x35f   : > { %v2922_v36 = vpop.eup %2921  ;;  %v1922_v9 = vrot.slane %v2920_v6, 2 }
 0x360   : > { %v1925_v29 = vrot.slane %v2922_v36, 1 }
 0x361   : > { %v1924_v33 = vsel %vm1923_vm7, %v1922_v9, %v1921_v25 }
 0x362   : > { %v1927_v59 = vsel %vm1926_vm8, %v1925_v29, %v1924_v33 }
 0x363   : > { %1929 = vst.msk [vmem:[%s427_s17] sm:$0xff] %vm482_vm1, %v1927_v59 }
 0x364   : > { %2954 = shalt.err (!%p2951_p3)
}
 0x365   : > { %s2955_s26 = scalar_lea.hbm %s4018_s16, 128  ;;  %s2959_s27 = scalar_lea.hbm %s4073_s9, 256 }
 0x366   : > { %p2956_p4 = scmp.ne.s32.totalorder %s4018_s16, %s2955_s26  ;;  %p2960_p11 = scmp.lt.s32.totalorder %s4018_s16, %s4073_s9 }
 0x367   : > { %p2961_p12 = scmp.lt.s32.totalorder %s2959_s27, %s2955_s26 }
 0x368   : > { %p2957_p7 = pnand %p2956_p4, %p3106_p5 }
 0x369   : > { %p2962_p9 = por %p2961_p12, %p2960_p11 }
 0x36a   : > { %p2958_p8 = pneg %p2957_p7 }
 0x36c   : > { %p2963_p10 = pnand %p2962_p9, %p2958_p8 }
 0x36e   : > { %2966 = shalt.err (!%p2963_p10)
}
 0x36f   : > { %2754 = dma.vmem_to_hbm [thread:$0]  (%p3106_p5), %s2276_s29, 128, %s4018_s16, %s2259_s0   ;;  %v2175_v40 = vmul.f32 1.442695, %v3874_v52  ;;  %v2137_v18 = vstv %s3870_s28  ;;  %v2136_v13 = vpop.xlane.xlu1 %2135  ;;  %v2187_v62 = vpop.xlane.xlu0 %2186  ;;  %v2139_v20 = vstv %s3885_s24  ;;  %vm2252_vm9 = vcmask 7168  }
 0x370   : > { %v2138_v22 = vmul.f32 %v2137_v18, %v2136_v13  ;;  %s462_s2 = scalar_lea.vmem %s4072_s8, %s3150_s21 }
 0x371   : > { %2923 = vpow2.f32 %v2175_v40 }
 0x372   : > { %v2140_v47 = vadd.f32 %v2139_v20, %v2138_v22 }
 0x373   : > { %v2238_v34 = vpop.xlane.xlu0 %2237 }
 0x375   : > { %v2172_v11 = vpop.permute.xlu1 %2171 }
 0x376   : > { %v2174_v1 = vadd.f32 %v2172_v11, %v2140_v47 }
 0x377   : > { %v2249_v37 = vpop.xlane.xlu0 %2248 }
 0x378   : > { %v2250_v2 = vmul.f32 %v2249_v37, %v1849_v10 }
 0x37e   : > { %v2924_v0 = vpop.eup %2923 }
 0x37f   : > { %v2177_v60 = vmul.f32 %v2924_v0, %v2174_v1 }
 0x381   : > { %v2188_v56 = vadd.f32 %v2187_v62, %v2177_v60 }
 0x383   : > { %v2239_v35 = vadd.f32 %v2238_v34, %v2188_v56 }
 0x385   : > { %v2251_v52 = vsub.f32 %v2239_v35, %v2250_v2 }
 0x387   : > { %2253 = vst.msk [vmem:[%s462_s2] sm:$0xff] %vm2252_vm9, %v2251_v52 }
 0x388 PF: > { %p2766_p5 = scmp.ge.s32.totalorder %s3005_s12, 2  ;;  %s2294_s19 = sand.u32 1, %s2993_s30  }
 0x389   : > { %s2295_s28 = scalar_lea.sflag [#allocation3], %s2294_s19 }
 0x38a   : > { %p2761_p13 = pnand %p2766_p5, %p3110_p6 }
 0x38c   : > { %p2762_p0 = pneg %p2761_p13 }
 0x38e   : > { %2988 = dma.done.wait (%p2762_p0), %s2295_s28, 128  }
 0x38f   : > { %2990 = vsyncadd (%p2762_p0), %s2295_s28, 4294967168  ;;  %p21_p1 = scmp.ge.s32.totalorder %s3093_s15, 4   ;;  %s4163_s30 = smov %s2997_s10 }
 0x390   : > { %s4164_s10 = smov %s3001_s11  ;;  %s4165_s11 = smov %s3104_s18 }
 0x391   : > { %s4166_s12 = smov %s3093_s15  ;;  %23 = sbr.rel (!%p21_p1) target bundleno = 8 (0x8), region = 122 }
 0x396   :  { %2300 = vsyncpa [#allocation3], 1 }
 0x397   :  { %2302 = vsyncpa [#allocation3 + $0x1], 1 }
 0x398   :  { %2303 = vsyncpa [#allocation4], 1 }
 0x399   :  { %2305 = vsyncpa [#allocation4 + $0x1], 1 }

</bundles_post_ra>
